<compile_context>
chip_gen: v6e
topology: v6e:2x2x1
jax: 0.10.0
libtpu: 0.0.40
codegen_flags: <defaults>
</compile_context>

<pallas_src>
import functools

import jax
import jax.numpy as jnp
from jax.experimental import pallas as pl
from jax.experimental.pallas import tpu as pltpu

# MXU operands are fed in bf16 (2x MXU rate, half the operand DMA/VMEM bytes);
# accumulation and all VPU/EUP elementwise math stay in f32.
MXU_DTYPE = jnp.bfloat16


# ---------------------------------------------------------------------------
# Small helpers: rounding, VMEM budgeting, q-tile selection
# ---------------------------------------------------------------------------
def _round_up(x, m):
    return ((x + m - 1) // m) * m


def _vmem_physical_bytes():
    try:
        return int(pltpu.get_tpu_info().vmem_capacity_bytes)
    except Exception:
        return 64 * 1024 * 1024      # conservative fallback (v7x per-TC VMEM)


def _vmem_estimate(tq, Ls, H, nK, nV, n_heads, attn_bytes, has_mask, emit_attn):
    """Rough per-grid-step VMEM footprint (double-buffered blocks + scratch)."""
    f32, bf16 = 4, 2
    b = 2 * tq * H * f32                        # q block (also residual)
    b += 2 * 2 * Ls * H * f32                   # k, v blocks
    b += 2 * tq * H * f32                       # out block
    if emit_attn:
        b += 2 * n_heads * tq * Ls * attn_bytes  # attn-probs output block
    if has_mask:
        b += 2 * tq * Ls * 1                    # int8 mask block
    b += 2 * 2 * (H * nK + H * nV) * bf16       # wq+wk, wv+w_out (double-buffered)
    b += 2 * 2 * H * f32                        # gamma, beta
    b += Ls * (nK + nV) * bf16                  # persistent kp/vp scratch
    # transient f32 intermediates (qp, per-head score/exp/prob, ctx, LN temps)
    b += tq * nK * f32 + 3 * tq * Ls * f32 + tq * nV * f32 + 2 * tq * H * f32
    return b


def _pick_q_tile(Lq, fits):
    """Largest q-row tile that fits the VMEM budget; never below 128 for long Lq."""
    if Lq <= 512:
        tq = max(8, _round_up(Lq, 8))      # single tile over the (8-aligned) length
        if fits(tq):
            return tq
    cap = _round_up(max(Lq, 128), 128)
    for tq in (512, 256, 128):
        if tq <= cap and fits(tq):
            return tq
    return 128                             # floor; correctness preserved either way


# ---------------------------------------------------------------------------
# Fused kernel: (cached) K/V projection -> Q projection -> attention (all heads)
#               -> concat -> out proj -> residual add -> LayerNorm
# ---------------------------------------------------------------------------
def _mha_fused_kernel(*refs, n_heads, k_size, v_size, eps, has_mask, emit_attn):
    n_in = 9 + (1 if has_mask else 0)
    (q_ref, k_ref, v_ref, wq_ref, wk_ref, wv_ref, wo_ref,
     g_ref, beta_ref) = refs[:9]
    m_ref = refs[9] if has_mask else None
    out_ref = refs[n_in]
    attn_ref = refs[n_in + 1] if emit_attn else None
    kp_s, vp_s = refs[-2], refs[-1]

    f32 = jnp.float32

    # K/V projections: computed ONCE per batch (q-tile axis is the inner
    # "arbitrary" grid axis), cached in persistent bf16 VMEM scratch and reused
    # by every q tile of this batch.
    @pl.when(pl.program_id(1) == 0)
    def _():
        kx = k_ref[...].astype(MXU_DTYPE)
        vx = v_ref[...].astype(MXU_DTYPE)
        kp_s[...] = jnp.dot(kx, wk_ref[...],
                            preferred_element_type=f32).astype(MXU_DTYPE)
        vp_s[...] = jnp.dot(vx, wv_ref[...],
                            preferred_element_type=f32).astype(MXU_DTYPE)

    q_in = q_ref[...]                             # (tq, H) f32 -- also the residual
    qx = q_in.astype(MXU_DTYPE)
    # 1/sqrt(k_size) is pre-folded into the packed wq weights by prepare_params().
    qp = jnp.dot(qx, wq_ref[...], preferred_element_type=f32).astype(MXU_DTYPE)

    kp = kp_s[...]                                # (Ls, n*K) bf16 (cached)
    vp = vp_s[...]                                # (Ls, n*V) bf16 (cached)

    if has_mask:
        # TODO(synk): torch masked_fill_(mask != 0, -inf) semantics; a large
        # negative additive bias keeps fully-masked rows finite (uniform probs).
        mbias = jnp.where(m_ref[...] != 0, jnp.float32(-1e30), jnp.float32(0.0))

    ctx_parts = []
    for h in range(n_heads):        # static unroll; per-head data stays in VMEM/vregs
        q_h = qp[:, h * k_size:(h + 1) * k_size]
        k_h = kp[:, h * k_size:(h + 1) * k_size]
        v_h = vp[:, h * v_size:(h + 1) * v_size]

        # Contract last dims of both operands (no explicit K transpose).
        s = jax.lax.dot_general(q_h, k_h, (((1,), (1,)), ((), ())),
                                preferred_element_type=f32)           # (tq, Ls)
        if has_mask:
            s = s + mbias
        s = s - jnp.max(s, axis=-1, keepdims=True)                    # stable softmax
        e = jnp.exp(s)
        p = e * pl.reciprocal(jnp.sum(e, axis=-1, keepdims=True), approx=True)
        if emit_attn:
            attn_ref[h, 0, :, :] = p.astype(attn_ref.dtype)           # bf16 by default
        ctx_parts.append(
            jnp.dot(p.astype(MXU_DTYPE), v_h, preferred_element_type=f32))

    # Head-major feature concat == torch split(dim=0) + cat(dim=-1).
    ctx = jnp.concatenate(ctx_parts, axis=-1).astype(MXU_DTYPE)       # (tq, n*V)

    y = jnp.dot(ctx, wo_ref[...], preferred_element_type=f32)         # (tq, H)
    # TODO(synk): dropout (p=0.1) omitted — inference / eval-mode semantics.
    y = y + q_in
    mean = jnp.mean(y, axis=-1, keepdims=True)
    var = jnp.mean(jnp.square(y - mean), axis=-1, keepdims=True)
    yn = (y - mean) * jax.lax.rsqrt(var + eps)
    out_ref[...] = (yn * g_ref[...] + beta_ref[...]).astype(out_ref.dtype)


# ---------------------------------------------------------------------------
# Module forward
# ---------------------------------------------------------------------------
def multi_head_attention(q, k, v, params, n_heads, mask=None, *, eps=1e-6,
                         return_attn=True, attn_dtype=jnp.bfloat16, q_tile=None):
    """q: [B, Lq, H], k/v: [B, Ls, H] -> (out [B, Lq, H],
                                          attn [n_heads*B, Lq, Ls] or None).

    NOTE: eps default is 1e-6; torch.nn.LayerNorm would use 1e-5 (the reference
    module uses a custom LayerNorm class, so eps is exposed as a kwarg).
    """
    B, Lq, H = q.shape
    _, Ls, _ = k.shape
    nK = params["wq"].shape[1]
    nV = params["wv"].shape[1]
    k_size = nK // n_heads
    v_size = nV // n_heads
    has_mask = mask is not None
    emit_attn = bool(return_attn)

    attn_bytes = jnp.dtype(attn_dtype).itemsize
    # ~0.75x physical VMEM: ≈48 MiB on v7x (64 MiB/TC), ≈96 MiB on v5e/v6e.
    vmem_cap = (3 * _vmem_physical_bytes()) // 4

    def fits(tq):
        return _vmem_estimate(tq, Ls, H, nK, nV, n_heads, attn_bytes,
                              has_mask, emit_attn) <= vmem_cap

    tq = int(q_tile) if q_tile is not None else _pick_q_tile(Lq, fits)
    Lq_pad = _round_up(Lq, tq)        # non-divisible Lq: pad q rows, slice outputs

    q_in = q if Lq_pad == Lq else jnp.pad(q, ((0, 0), (0, Lq_pad - Lq), (0, 0)))
    args = [q_in, k, v, params["wq"], params["wk"], params["wv"],
            params["w_out"], params["gamma"], params["beta"]]

    in_specs = [
        pl.BlockSpec((None, tq, H), lambda b, qi: (b, qi, 0)),   # q (also residual)
        pl.BlockSpec((None, Ls, H), lambda b, qi: (b, 0, 0)),    # k (DMA once per batch)
        pl.BlockSpec((None, Ls, H), lambda b, qi: (b, 0, 0)),    # v (DMA once per batch)
        # TODO(synk): grid-invariant weight blocks could be single-buffered
        # (pipeline_mode=pl.Buffered(1)) to reclaim VMEM on v7x.
        pl.BlockSpec((H, nK), lambda b, qi: (0, 0)),             # packed q_proj (scale folded)
        pl.BlockSpec((H, nK), lambda b, qi: (0, 0)),             # packed k_proj
        pl.BlockSpec((H, nV), lambda b, qi: (0, 0)),             # packed v_proj
        pl.BlockSpec((nV, H), lambda b, qi: (0, 0)),             # w_out (pre-transposed)
        pl.BlockSpec((1, H), lambda b, qi: (0, 0)),              # gamma
        pl.BlockSpec((1, H), lambda b, qi: (0, 0)),              # beta
    ]
    if has_mask:
        m = mask.astype(jnp.int8)     # 4x less DMA / VMEM than f32; nonzero == masked
        if Lq_pad != Lq:
            m = jnp.pad(m, ((0, 0), (0, Lq_pad - Lq), (0, 0)))
        args.append(m)
        in_specs.append(pl.BlockSpec((None, tq, Ls), lambda b, qi: (b, qi, 0)))

    out_shape = [jax.ShapeDtypeStruct((B, Lq_pad, H), q.dtype)]
    out_specs = [pl.BlockSpec((None, tq, H), lambda b, qi: (b, qi, 0))]
    if emit_attn:
        out_shape.append(jax.ShapeDtypeStruct((n_heads, B, Lq_pad, Ls), attn_dtype))
        out_specs.append(pl.BlockSpec((n_heads, 1, tq, Ls),
                                      lambda b, qi: (0, b, qi, 0)))

    grid = (B, Lq_pad // tq)
    # Batch axis is "parallel" (feeds both v7x TensorCores whenever B >= 2);
    # q-tile axis must be "arbitrary" so the per-batch cached K/V projections
    # in VMEM scratch are valid across q tiles.
    result = pl.pallas_call(
        functools.partial(_mha_fused_kernel, n_heads=n_heads, k_size=k_size,
                          v_size=v_size, eps=eps, has_mask=has_mask,
                          emit_attn=emit_attn),
        out_shape=tuple(out_shape) if emit_attn else out_shape[0],
        grid=grid,
        in_specs=in_specs,
        out_specs=tuple(out_specs) if emit_attn else out_specs[0],
        scratch_shapes=[pltpu.VMEM((Ls, nK), MXU_DTYPE),   # cached K projection
                        pltpu.VMEM((Ls, nV), MXU_DTYPE)],  # cached V projection
        compiler_params=pltpu.CompilerParams(
            dimension_semantics=("parallel", "arbitrary"),
            vmem_limit_bytes=vmem_cap,
        ),
    )(*args)

    if emit_attn:
        out, attn = result
    else:
        out, attn = result, None

    if Lq_pad != Lq:
        out = out[:, :Lq, :]
        if attn is not None:
            attn = attn[:, :, :Lq, :]
    if attn is not None:
        # [n_heads, B, Lq, Ls] -> [n_heads*B, Lq, Ls]: head-major contiguous view,
        # exactly matching the torch layout.
        attn = attn.reshape(n_heads * B, Lq, Ls)
    return out, attn


# ---------------------------------------------------------------------------
# Parameters: torch-layout init + one-time repacking into kernel layout
# ---------------------------------------------------------------------------
def init_params(key, n_heads, h_size, k_size, v_size):
    kq, kk, kv, ko = jax.random.split(key, 4)

    def xavier(k, shape, fan_in, fan_out):
        std = (2.0 / (fan_in + fan_out)) ** 0.5
        return std * jax.random.normal(k, shape, dtype=jnp.float32)

    return {
        "q_proj": xavier(kq, (n_heads, h_size, k_size), h_size, k_size),
        "k_proj": xavier(kk, (n_heads, h_size, k_size), h_size, k_size),
        "v_proj": xavier(kv, (n_heads, h_size, v_size), h_size, v_size),
        # stored transposed relative to torch.nn.Linear.weight
        "w_out": xavier(ko, (n_heads * v_size, h_size), n_heads * v_size, h_size),
        "gamma": jnp.ones((1, h_size), jnp.float32),
        "beta": jnp.zeros((1, h_size), jnp.float32),
    }


def prepare_params(params, n_heads, dtype=MXU_DTYPE, pad_head_to=None):
    """Repack torch-layout params into the fused-kernel layout (done once).

    * per-head [n_heads, H, P] projections -> head-major [H, n_heads*P] slabs
    * 1/sqrt(k_size) folded into the packed q-projection weights (free at pack time)
    * optional zero-padding of each head's feature columns to `pad_head_to` lanes
      (e.g. 128) so per-head slices are vreg-aligned when k_size/v_size < 128
    """
    k_size = params["q_proj"].shape[-1]
    v_size = params["v_proj"].shape[-1]
    scale = 1.0 / float(k_size) ** 0.5

    def pack(w, mul=1.0, pad_to=None):
        n, H, P = w.shape
        w = w * mul
        if pad_to is not None and pad_to > P:
            w = jnp.pad(w, ((0, 0), (0, 0), (0, pad_to - P)))
        return jnp.transpose(w, (1, 0, 2)).reshape(H, -1).astype(dtype)

    w_out = params["w_out"]                        # [n_heads*v_size, H]
    if pad_head_to is not None and pad_head_to > v_size:
        w_out = w_out.reshape(n_heads, v_size, -1)
        w_out = jnp.pad(w_out, ((0, 0), (0, pad_head_to - v_size), (0, 0)))
        w_out = w_out.reshape(n_heads * pad_head_to, -1)

    return {
        "wq": pack(params["q_proj"], mul=scale, pad_to=pad_head_to),
        "wk": pack(params["k_proj"], pad_to=pad_head_to),
        "wv": pack(params["v_proj"], pad_to=pad_head_to),
        "w_out": w_out.astype(dtype),              # [n_heads*V(_pad), H]
        "gamma": params["gamma"].astype(jnp.float32),
        "beta": params["beta"].astype(jnp.float32),
    }


# ---------------------------------------------------------------------------
# Pure-JAX f32 reference (mirrors the torch module) for a sanity check
# ---------------------------------------------------------------------------
def multi_head_attention_ref(q, k, v, raw, n_heads, mask=None, eps=1e-6):
    B, Lq, H = q.shape
    _, Ls, _ = k.shape
    K = raw["q_proj"].shape[-1]
    qp = jnp.einsum("bqh,nhk->nbqk", q, raw["q_proj"])
    kp = jnp.einsum("bsh,nhk->nbsk", k, raw["k_proj"])
    vp = jnp.einsum("bsh,nhv->nbsv", v, raw["v_proj"])
    s = jnp.einsum("nbqk,nbsk->nbqs", qp, kp) / jnp.sqrt(float(K))
    if mask is not None:
        s = s + jnp.where(mask[None, ...] != 0, -1e30, 0.0)
    p = jax.nn.softmax(s, axis=-1)
    ctx = jnp.einsum("nbqs,nbsv->nbqv", p, vp)
    ctx = jnp.transpose(ctx, (1, 2, 0, 3)).reshape(B, Lq, -1)   # head-major concat
    y = ctx @ raw["w_out"] + q
    mean = y.mean(-1, keepdims=True)
    var = ((y - mean) ** 2).mean(-1, keepdims=True)
    out = (y - mean) / jnp.sqrt(var + eps) * raw["gamma"] + raw["beta"]
    return out, p.reshape(n_heads * B, Lq, Ls)


if __name__ == "__main__":
    B, Ls = 2, 16
    n_heads, h_size, k_size, v_size = 4, 32, 16, 16

    key = jax.random.PRNGKey(0)
    kp_, kq, kk, kv = jax.random.split(key, 4)
    raw_params = init_params(kp_, n_heads, h_size, k_size, v_size)
    params = prepare_params(raw_params, n_heads)

    k = jax.random.normal(kk, (B, Ls, h_size), dtype=jnp.float32)
    v = jax.random.normal(kv, (B, Ls, h_size), dtype=jnp.float32)

    def check(Lq, mask=None, q_tile=None, return_attn=True):
        q = jax.random.normal(jax.random.fold_in(kq, Lq), (B, Lq, h_size),
                              dtype=jnp.float32)
        out, attn = multi_head_attention(q, k, v, params, n_heads, mask=mask,
                                         q_tile=q_tile, return_attn=return_attn)
        jax.block_until_ready(out)
        out_ref, attn_ref = multi_head_attention_ref(q, k, v, raw_params,
                                                     n_heads, mask=mask)
        assert out.shape == (B, Lq, h_size)
        # Loose tolerance: kernel uses bf16 MXU operands + approx reciprocal.
        assert float(jnp.max(jnp.abs(out - out_ref))) < 0.3
        if return_attn:
            assert attn.shape == (n_heads * B, Lq, Ls)
            assert float(jnp.max(jnp.abs(attn.astype(jnp.float32) - attn_ref))) < 0.1
        else:
            assert attn is None

    # 1) basic: no mask, bf16 attention probs returned
    check(Lq=16)

    # 2) with an int8 "nonzero == masked" causal mask
    Lq = 16
    causal = (jnp.arange(Ls)[None, :] > jnp.arange(Lq)[:, None]).astype(jnp.int8)
    check(Lq=Lq, mask=jnp.broadcast_to(causal, (B, Lq, Ls)))

    # 3) multiple q tiles per batch + non-divisible Lq: exercises the padded q
    #    rows and the once-per-batch K/V projection cache reused across q tiles
    check(Lq=28, q_tile=16)

    # 4) attention-probs output elided entirely (removes the largest HBM stream)
    check(Lq=16, return_attn=False)

    print("KERNEL_OK")
</pallas_src>

<mosaic_0001>
module attributes {stable_mosaic.version = 11 : i64} {
  func.func @_mha_fused_kernel(%arg0: i32, %arg1: i32, %arg2: memref<1x16x32xf32, #tpu.memory_space<vmem>>, %arg3: memref<1x16x32xf32, #tpu.memory_space<vmem>>, %arg4: memref<1x16x32xf32, #tpu.memory_space<vmem>>, %arg5: memref<32x64xbf16, #tpu.memory_space<vmem>>, %arg6: memref<32x64xbf16, #tpu.memory_space<vmem>>, %arg7: memref<32x64xbf16, #tpu.memory_space<vmem>>, %arg8: memref<64x32xbf16, #tpu.memory_space<vmem>>, %arg9: memref<1x32xf32, #tpu.memory_space<vmem>>, %arg10: memref<1x32xf32, #tpu.memory_space<vmem>>, %arg11: memref<1x16x32xf32, #tpu.memory_space<vmem>>, %arg12: memref<4x1x16x16xbf16, #tpu.memory_space<vmem>>, %arg13: memref<16x64xbf16, #tpu.memory_space<vmem>>, %arg14: memref<16x64xbf16, #tpu.memory_space<vmem>>) attributes {dimension_semantics = [#tpu.dimension_semantics<parallel>, #tpu.dimension_semantics<arbitrary>], iteration_bounds = array<i64: 2, 1>, scalar_prefetch = 0 : i64, scratch_operands = 2 : i64, tpu.core_type = #tpu.core_type<tc>, window_params = [{transform_indices = @transform_0, window_bounds = array<i64: 1, 16, 32>}, {transform_indices = @transform_1, window_bounds = array<i64: 1, 16, 32>}, {transform_indices = @transform_2, window_bounds = array<i64: 1, 16, 32>}, {pipeline_mode = #tpu.pipeline_mode<synchronous>, transform_indices = @transform_3, window_bounds = array<i64: 32, 64>}, {pipeline_mode = #tpu.pipeline_mode<synchronous>, transform_indices = @transform_4, window_bounds = array<i64: 32, 64>}, {pipeline_mode = #tpu.pipeline_mode<synchronous>, transform_indices = @transform_5, window_bounds = array<i64: 32, 64>}, {pipeline_mode = #tpu.pipeline_mode<synchronous>, transform_indices = @transform_6, window_bounds = array<i64: 64, 32>}, {pipeline_mode = #tpu.pipeline_mode<synchronous>, transform_indices = @transform_7, window_bounds = array<i64: 1, 32>}, {pipeline_mode = #tpu.pipeline_mode<synchronous>, transform_indices = @transform_8, window_bounds = array<i64: 1, 32>}, {transform_indices = @transform_9, window_bounds = array<i64: 1, 16, 32>}, {transform_indices = @transform_10, window_bounds = array<i64: 4, 1, 16, 16>}]} {
    %c0_i32 = arith.constant 0 : i32
    %0 = arith.cmpi eq, %arg1, %c0_i32 : i32
    %1 = arith.extui %0 : i1 to i32
    %c0_i32_0 = arith.constant 0 : i32
    %2 = arith.cmpi ne, %1, %c0_i32_0 : i32
    scf.if %2 {
      %c0_53 = arith.constant 0 : index
      %c0_54 = arith.constant 0 : index
      %c0_55 = arith.constant 0 : index
      %123 = vector.load %arg3[%c0_53, %c0_54, %c0_55] : memref<1x16x32xf32, #tpu.memory_space<vmem>>, vector<1x16x32xf32>
      %124 = vector.shape_cast %123 : vector<1x16x32xf32> to vector<16x32xf32>
      %125 = arith.truncf %124 : vector<16x32xf32> to vector<16x32xbf16>
      %c0_56 = arith.constant 0 : index
      %c0_57 = arith.constant 0 : index
      %c0_58 = arith.constant 0 : index
      %126 = vector.load %arg4[%c0_56, %c0_57, %c0_58] : memref<1x16x32xf32, #tpu.memory_space<vmem>>, vector<1x16x32xf32>
      %127 = vector.shape_cast %126 : vector<1x16x32xf32> to vector<16x32xf32>
      %128 = arith.truncf %127 : vector<16x32xf32> to vector<16x32xbf16>
      %c0_59 = arith.constant 0 : index
      %c0_60 = arith.constant 0 : index
      %129 = vector.load %arg6[%c0_59, %c0_60] : memref<32x64xbf16, #tpu.memory_space<vmem>>, vector<32x64xbf16>
      %cst_61 = arith.constant dense<0.000000e+00> : vector<16x64xf32>
      %130 = tpu.matmul %125, %129, %cst_61 {dimension_numbers = #tpu.dot_dimension_numbers<[1], [0], [0], [1], [0, 0, 1, 1], [], []>} : vector<16x32xbf16>, vector<32x64xbf16>, vector<16x64xf32> -> vector<16x64xf32>
      %131 = arith.truncf %130 : vector<16x64xf32> to vector<16x64xbf16>
      %c0_62 = arith.constant 0 : index
      %c0_63 = arith.constant 0 : index
      %132 = vector.load %arg13[%c0_62, %c0_63] : memref<16x64xbf16, #tpu.memory_space<vmem>>, vector<16x64xbf16>
      tpu.vector_store %arg13[%c0_62, %c0_63], %131 {strides = array<i32>} : memref<16x64xbf16, #tpu.memory_space<vmem>>, vector<16x64xbf16>,
      %c0_64 = arith.constant 0 : index
      %c0_65 = arith.constant 0 : index
      %133 = vector.load %arg7[%c0_64, %c0_65] : memref<32x64xbf16, #tpu.memory_space<vmem>>, vector<32x64xbf16>
      %cst_66 = arith.constant dense<0.000000e+00> : vector<16x64xf32>
      %134 = tpu.matmul %128, %133, %cst_66 {dimension_numbers = #tpu.dot_dimension_numbers<[1], [0], [0], [1], [0, 0, 1, 1], [], []>} : vector<16x32xbf16>, vector<32x64xbf16>, vector<16x64xf32> -> vector<16x64xf32>
      %135 = arith.truncf %134 : vector<16x64xf32> to vector<16x64xbf16>
      %c0_67 = arith.constant 0 : index
      %c0_68 = arith.constant 0 : index
      %136 = vector.load %arg14[%c0_67, %c0_68] : memref<16x64xbf16, #tpu.memory_space<vmem>>, vector<16x64xbf16>
      tpu.vector_store %arg14[%c0_67, %c0_68], %135 {strides = array<i32>} : memref<16x64xbf16, #tpu.memory_space<vmem>>, vector<16x64xbf16>,
    } else {
    }
    %c0 = arith.constant 0 : index
    %c0_1 = arith.constant 0 : index
    %c0_2 = arith.constant 0 : index
    %3 = vector.load %arg2[%c0, %c0_1, %c0_2] : memref<1x16x32xf32, #tpu.memory_space<vmem>>, vector<1x16x32xf32>
    %4 = vector.shape_cast %3 : vector<1x16x32xf32> to vector<16x32xf32>
    %5 = arith.truncf %4 : vector<16x32xf32> to vector<16x32xbf16>
    %c0_3 = arith.constant 0 : index
    %c0_4 = arith.constant 0 : index
    %6 = vector.load %arg5[%c0_3, %c0_4] : memref<32x64xbf16, #tpu.memory_space<vmem>>, vector<32x64xbf16>
    %cst = arith.constant dense<0.000000e+00> : vector<16x64xf32>
    %7 = tpu.matmul %5, %6, %cst {dimension_numbers = #tpu.dot_dimension_numbers<[1], [0], [0], [1], [0, 0, 1, 1], [], []>} : vector<16x32xbf16>, vector<32x64xbf16>, vector<16x64xf32> -> vector<16x64xf32>
    %8 = arith.truncf %7 : vector<16x64xf32> to vector<16x64xbf16>
    %c0_5 = arith.constant 0 : index
    %c0_6 = arith.constant 0 : index
    %9 = vector.load %arg13[%c0_5, %c0_6] : memref<16x64xbf16, #tpu.memory_space<vmem>>, vector<16x64xbf16>
    %c0_7 = arith.constant 0 : index
    %c0_8 = arith.constant 0 : index
    %10 = vector.load %arg14[%c0_7, %c0_8] : memref<16x64xbf16, #tpu.memory_space<vmem>>, vector<16x64xbf16>
    %11 = vector.extract_strided_slice %8 {offsets = [0, 0], sizes = [16, 16], strides = [1, 1]} : vector<16x64xbf16> to vector<16x16xbf16>
    %12 = vector.extract_strided_slice %9 {offsets = [0, 0], sizes = [16, 16], strides = [1, 1]} : vector<16x64xbf16> to vector<16x16xbf16>
    %13 = vector.extract_strided_slice %10 {offsets = [0, 0], sizes = [16, 16], strides = [1, 1]} : vector<16x64xbf16> to vector<16x16xbf16>
    %cst_9 = arith.constant dense<0.000000e+00> : vector<16x16xf32>
    %14 = tpu.matmul %11, %12, %cst_9 {dimension_numbers = #tpu.dot_dimension_numbers<[1], [1], [0], [0], [0, 0, 1, 0], [], []>} : vector<16x16xbf16>, vector<16x16xbf16>, vector<16x16xf32> -> vector<16x16xf32>
    %cst_10 = arith.constant dense<0xFF800000> : vector<16xf32>
    %15 = vector.multi_reduction <maximumf>, %14, %cst_10 [1] : vector<16x16xf32> to vector<16xf32>
    %16 = vector.shape_cast %15 : vector<16xf32> to vector<16x1xf32>
    %17 = vector.broadcast %16 : vector<16x1xf32> to vector<16x16xf32>
    %18 = arith.subf %14, %17 : vector<16x16xf32>
    %19 = math.exp %18 : vector<16x16xf32>
    %cst_11 = arith.constant dense<0.000000e+00> : vector<16xf32>
    %20 = vector.multi_reduction <add>, %19, %cst_11 [1] : vector<16x16xf32> to vector<16xf32>
    %21 = vector.shape_cast %20 : vector<16xf32> to vector<16x1xf32>
    %22 = tpu.reciprocal %21 {approx = true} : vector<16x1xf32> -> vector<16x1xf32>
    %23 = vector.broadcast %22 : vector<16x1xf32> to vector<16x16xf32>
    %24 = arith.mulf %19, %23 : vector<16x16xf32>
    %25 = arith.truncf %24 : vector<16x16xf32> to vector<16x16xbf16>
    %c0_12 = arith.constant 0 : index
    %c0_13 = arith.constant 0 : index
    %c0_14 = arith.constant 0 : index
    %c0_15 = arith.constant 0 : index
    %26 = vector.load %arg12[%c0_12, %c0_13, %c0_14, %c0_15] : memref<4x1x16x16xbf16, #tpu.memory_space<vmem>>, vector<1x1x16x16xbf16>
    %27 = vector.shape_cast %26 : vector<1x1x16x16xbf16> to vector<16x16xbf16>
    %28 = vector.shape_cast %25 : vector<16x16xbf16> to vector<1x1x16x16xbf16>
    tpu.vector_store %arg12[%c0_12, %c0_13, %c0_14, %c0_15], %28 {strides = array<i32>} : memref<4x1x16x16xbf16, #tpu.memory_space<vmem>>, vector<1x1x16x16xbf16>,
    %29 = arith.truncf %24 : vector<16x16xf32> to vector<16x16xbf16>
    %cst_16 = arith.constant dense<0.000000e+00> : vector<16x16xf32>
    %30 = tpu.matmul %29, %13, %cst_16 {dimension_numbers = #tpu.dot_dimension_numbers<[1], [0], [0], [1], [0, 0, 1, 1], [], []>} : vector<16x16xbf16>, vector<16x16xbf16>, vector<16x16xf32> -> vector<16x16xf32>
    %31 = vector.extract_strided_slice %8 {offsets = [0, 16], sizes = [16, 16], strides = [1, 1]} : vector<16x64xbf16> to vector<16x16xbf16>
    %32 = vector.extract_strided_slice %9 {offsets = [0, 16], sizes = [16, 16], strides = [1, 1]} : vector<16x64xbf16> to vector<16x16xbf16>
    %33 = vector.extract_strided_slice %10 {offsets = [0, 16], sizes = [16, 16], strides = [1, 1]} : vector<16x64xbf16> to vector<16x16xbf16>
    %cst_17 = arith.constant dense<0.000000e+00> : vector<16x16xf32>
    %34 = tpu.matmul %31, %32, %cst_17 {dimension_numbers = #tpu.dot_dimension_numbers<[1], [1], [0], [0], [0, 0, 1, 0], [], []>} : vector<16x16xbf16>, vector<16x16xbf16>, vector<16x16xf32> -> vector<16x16xf32>
    %cst_18 = arith.constant dense<0xFF800000> : vector<16xf32>
    %35 = vector.multi_reduction <maximumf>, %34, %cst_18 [1] : vector<16x16xf32> to vector<16xf32>
    %36 = vector.shape_cast %35 : vector<16xf32> to vector<16x1xf32>
    %37 = vector.broadcast %36 : vector<16x1xf32> to vector<16x16xf32>
    %38 = arith.subf %34, %37 : vector<16x16xf32>
    %39 = math.exp %38 : vector<16x16xf32>
    %cst_19 = arith.constant dense<0.000000e+00> : vector<16xf32>
    %40 = vector.multi_reduction <add>, %39, %cst_19 [1] : vector<16x16xf32> to vector<16xf32>
    %41 = vector.shape_cast %40 : vector<16xf32> to vector<16x1xf32>
    %42 = tpu.reciprocal %41 {approx = true} : vector<16x1xf32> -> vector<16x1xf32>
    %43 = vector.broadcast %42 : vector<16x1xf32> to vector<16x16xf32>
    %44 = arith.mulf %39, %43 : vector<16x16xf32>
    %45 = arith.truncf %44 : vector<16x16xf32> to vector<16x16xbf16>
    %c1 = arith.constant 1 : index
    %c0_20 = arith.constant 0 : index
    %c0_21 = arith.constant 0 : index
    %c0_22 = arith.constant 0 : index
    %46 = vector.load %arg12[%c1, %c0_20, %c0_21, %c0_22] : memref<4x1x16x16xbf16, #tpu.memory_space<vmem>>, vector<1x1x16x16xbf16>
    %47 = vector.shape_cast %46 : vector<1x1x16x16xbf16> to vector<16x16xbf16>
    %48 = vector.shape_cast %45 : vector<16x16xbf16> to vector<1x1x16x16xbf16>
    tpu.vector_store %arg12[%c1, %c0_20, %c0_21, %c0_22], %48 {strides = array<i32>} : memref<4x1x16x16xbf16, #tpu.memory_space<vmem>>, vector<1x1x16x16xbf16>,
    %49 = arith.truncf %44 : vector<16x16xf32> to vector<16x16xbf16>
    %cst_23 = arith.constant dense<0.000000e+00> : vector<16x16xf32>
    %50 = tpu.matmul %49, %33, %cst_23 {dimension_numbers = #tpu.dot_dimension_numbers<[1], [0], [0], [1], [0, 0, 1, 1], [], []>} : vector<16x16xbf16>, vector<16x16xbf16>, vector<16x16xf32> -> vector<16x16xf32>
    %51 = vector.extract_strided_slice %8 {offsets = [0, 32], sizes = [16, 16], strides = [1, 1]} : vector<16x64xbf16> to vector<16x16xbf16>
    %52 = vector.extract_strided_slice %9 {offsets = [0, 32], sizes = [16, 16], strides = [1, 1]} : vector<16x64xbf16> to vector<16x16xbf16>
    %53 = vector.extract_strided_slice %10 {offsets = [0, 32], sizes = [16, 16], strides = [1, 1]} : vector<16x64xbf16> to vector<16x16xbf16>
    %cst_24 = arith.constant dense<0.000000e+00> : vector<16x16xf32>
    %54 = tpu.matmul %51, %52, %cst_24 {dimension_numbers = #tpu.dot_dimension_numbers<[1], [1], [0], [0], [0, 0, 1, 0], [], []>} : vector<16x16xbf16>, vector<16x16xbf16>, vector<16x16xf32> -> vector<16x16xf32>
    %cst_25 = arith.constant dense<0xFF800000> : vector<16xf32>
    %55 = vector.multi_reduction <maximumf>, %54, %cst_25 [1] : vector<16x16xf32> to vector<16xf32>
    %56 = vector.shape_cast %55 : vector<16xf32> to vector<16x1xf32>
    %57 = vector.broadcast %56 : vector<16x1xf32> to vector<16x16xf32>
    %58 = arith.subf %54, %57 : vector<16x16xf32>
    %59 = math.exp %58 : vector<16x16xf32>
    %cst_26 = arith.constant dense<0.000000e+00> : vector<16xf32>
    %60 = vector.multi_reduction <add>, %59, %cst_26 [1] : vector<16x16xf32> to vector<16xf32>
    %61 = vector.shape_cast %60 : vector<16xf32> to vector<16x1xf32>
    %62 = tpu.reciprocal %61 {approx = true} : vector<16x1xf32> -> vector<16x1xf32>
    %63 = vector.broadcast %62 : vector<16x1xf32> to vector<16x16xf32>
    %64 = arith.mulf %59, %63 : vector<16x16xf32>
    %65 = arith.truncf %64 : vector<16x16xf32> to vector<16x16xbf16>
    %c2 = arith.constant 2 : index
    %c0_27 = arith.constant 0 : index
    %c0_28 = arith.constant 0 : index
    %c0_29 = arith.constant 0 : index
    %66 = vector.load %arg12[%c2, %c0_27, %c0_28, %c0_29] : memref<4x1x16x16xbf16, #tpu.memory_space<vmem>>, vector<1x1x16x16xbf16>
    %67 = vector.shape_cast %66 : vector<1x1x16x16xbf16> to vector<16x16xbf16>
    %68 = vector.shape_cast %65 : vector<16x16xbf16> to vector<1x1x16x16xbf16>
    tpu.vector_store %arg12[%c2, %c0_27, %c0_28, %c0_29], %68 {strides = array<i32>} : memref<4x1x16x16xbf16, #tpu.memory_space<vmem>>, vector<1x1x16x16xbf16>,
    %69 = arith.truncf %64 : vector<16x16xf32> to vector<16x16xbf16>
    %cst_30 = arith.constant dense<0.000000e+00> : vector<16x16xf32>
    %70 = tpu.matmul %69, %53, %cst_30 {dimension_numbers = #tpu.dot_dimension_numbers<[1], [0], [0], [1], [0, 0, 1, 1], [], []>} : vector<16x16xbf16>, vector<16x16xbf16>, vector<16x16xf32> -> vector<16x16xf32>
    %71 = vector.extract_strided_slice %8 {offsets = [0, 48], sizes = [16, 16], strides = [1, 1]} : vector<16x64xbf16> to vector<16x16xbf16>
    %72 = vector.extract_strided_slice %9 {offsets = [0, 48], sizes = [16, 16], strides = [1, 1]} : vector<16x64xbf16> to vector<16x16xbf16>
    %73 = vector.extract_strided_slice %10 {offsets = [0, 48], sizes = [16, 16], strides = [1, 1]} : vector<16x64xbf16> to vector<16x16xbf16>
    %cst_31 = arith.constant dense<0.000000e+00> : vector<16x16xf32>
    %74 = tpu.matmul %71, %72, %cst_31 {dimension_numbers = #tpu.dot_dimension_numbers<[1], [1], [0], [0], [0, 0, 1, 0], [], []>} : vector<16x16xbf16>, vector<16x16xbf16>, vector<16x16xf32> -> vector<16x16xf32>
    %cst_32 = arith.constant dense<0xFF800000> : vector<16xf32>
    %75 = vector.multi_reduction <maximumf>, %74, %cst_32 [1] : vector<16x16xf32> to vector<16xf32>
    %76 = vector.shape_cast %75 : vector<16xf32> to vector<16x1xf32>
    %77 = vector.broadcast %76 : vector<16x1xf32> to vector<16x16xf32>
    %78 = arith.subf %74, %77 : vector<16x16xf32>
    %79 = math.exp %78 : vector<16x16xf32>
    %cst_33 = arith.constant dense<0.000000e+00> : vector<16xf32>
    %80 = vector.multi_reduction <add>, %79, %cst_33 [1] : vector<16x16xf32> to vector<16xf32>
    %81 = vector.shape_cast %80 : vector<16xf32> to vector<16x1xf32>
    %82 = tpu.reciprocal %81 {approx = true} : vector<16x1xf32> -> vector<16x1xf32>
    %83 = vector.broadcast %82 : vector<16x1xf32> to vector<16x16xf32>
    %84 = arith.mulf %79, %83 : vector<16x16xf32>
    %85 = arith.truncf %84 : vector<16x16xf32> to vector<16x16xbf16>
    %c3 = arith.constant 3 : index
    %c0_34 = arith.constant 0 : index
    %c0_35 = arith.constant 0 : index
    %c0_36 = arith.constant 0 : index
    %86 = vector.load %arg12[%c3, %c0_34, %c0_35, %c0_36] : memref<4x1x16x16xbf16, #tpu.memory_space<vmem>>, vector<1x1x16x16xbf16>
    %87 = vector.shape_cast %86 : vector<1x1x16x16xbf16> to vector<16x16xbf16>
    %88 = vector.shape_cast %85 : vector<16x16xbf16> to vector<1x1x16x16xbf16>
    tpu.vector_store %arg12[%c3, %c0_34, %c0_35, %c0_36], %88 {strides = array<i32>} : memref<4x1x16x16xbf16, #tpu.memory_space<vmem>>, vector<1x1x16x16xbf16>,
    %89 = arith.truncf %84 : vector<16x16xf32> to vector<16x16xbf16>
    %cst_37 = arith.constant dense<0.000000e+00> : vector<16x16xf32>
    %90 = tpu.matmul %89, %73, %cst_37 {dimension_numbers = #tpu.dot_dimension_numbers<[1], [0], [0], [1], [0, 0, 1, 1], [], []>} : vector<16x16xbf16>, vector<16x16xbf16>, vector<16x16xf32> -> vector<16x16xf32>
    %91 = tpu.concatenate %30, %50, %70, %90 in 1 : vector<16x16xf32>, vector<16x16xf32>, vector<16x16xf32>, vector<16x16xf32> -> vector<16x64xf32>
    %92 = arith.truncf %91 : vector<16x64xf32> to vector<16x64xbf16>
    %c0_38 = arith.constant 0 : index
    %c0_39 = arith.constant 0 : index
    %93 = vector.load %arg8[%c0_38, %c0_39] : memref<64x32xbf16, #tpu.memory_space<vmem>>, vector<64x32xbf16>
    %cst_40 = arith.constant dense<0.000000e+00> : vector<16x32xf32>
    %94 = tpu.matmul %92, %93, %cst_40 {dimension_numbers = #tpu.dot_dimension_numbers<[1], [0], [0], [1], [0, 0, 1, 1], [], []>} : vector<16x64xbf16>, vector<64x32xbf16>, vector<16x32xf32> -> vector<16x32xf32>
    %95 = arith.addf %94, %4 : vector<16x32xf32>
    %cst_41 = arith.constant dense<0.000000e+00> : vector<16xf32>
    %96 = vector.multi_reduction <add>, %95, %cst_41 [1] : vector<16x32xf32> to vector<16xf32>
    %97 = vector.shape_cast %96 : vector<16xf32> to vector<16x1xf32>
    %cst_42 = arith.constant 3.200000e+01 : f32
    %98 = vector.broadcast %cst_42 : f32 to vector<16x1xf32>
    %99 = arith.divf %97, %98 : vector<16x1xf32>
    %100 = vector.broadcast %99 : vector<16x1xf32> to vector<16x32xf32>
    %101 = arith.subf %95, %100 : vector<16x32xf32>
    %102 = arith.mulf %101, %101 : vector<16x32xf32>
    %cst_43 = arith.constant dense<0.000000e+00> : vector<16xf32>
    %103 = vector.multi_reduction <add>, %102, %cst_43 [1] : vector<16x32xf32> to vector<16xf32>
    %104 = vector.shape_cast %103 : vector<16xf32> to vector<16x1xf32>
    %cst_44 = arith.constant 3.200000e+01 : f32
    %105 = vector.broadcast %cst_44 : f32 to vector<16x1xf32>
    %106 = arith.divf %104, %105 : vector<16x1xf32>
    %107 = vector.broadcast %99 : vector<16x1xf32> to vector<16x32xf32>
    %108 = arith.subf %95, %107 : vector<16x32xf32>
    %cst_45 = arith.constant 9.99999997E-7 : f32
    %109 = vector.broadcast %cst_45 : f32 to vector<16x1xf32>
    %110 = arith.addf %106, %109 : vector<16x1xf32>
    %111 = math.rsqrt %110 : vector<16x1xf32>
    %112 = vector.broadcast %111 : vector<16x1xf32> to vector<16x32xf32>
    %113 = arith.mulf %108, %112 : vector<16x32xf32>
    %c0_46 = arith.constant 0 : index
    %c0_47 = arith.constant 0 : index
    %114 = vector.load %arg9[%c0_46, %c0_47] : memref<1x32xf32, #tpu.memory_space<vmem>>, vector<1x32xf32>
    %115 = vector.broadcast %114 : vector<1x32xf32> to vector<16x32xf32>
    %116 = arith.mulf %113, %115 : vector<16x32xf32>
    %c0_48 = arith.constant 0 : index
    %c0_49 = arith.constant 0 : index
    %117 = vector.load %arg10[%c0_48, %c0_49] : memref<1x32xf32, #tpu.memory_space<vmem>>, vector<1x32xf32>
    %118 = vector.broadcast %117 : vector<1x32xf32> to vector<16x32xf32>
    %119 = arith.addf %116, %118 : vector<16x32xf32>
    %c0_50 = arith.constant 0 : index
    %c0_51 = arith.constant 0 : index
    %c0_52 = arith.constant 0 : index
    %120 = vector.load %arg11[%c0_50, %c0_51, %c0_52] : memref<1x16x32xf32, #tpu.memory_space<vmem>>, vector<1x16x32xf32>
    %121 = vector.shape_cast %120 : vector<1x16x32xf32> to vector<16x32xf32>
    %122 = vector.shape_cast %119 : vector<16x32xf32> to vector<1x16x32xf32>
    tpu.vector_store %arg11[%c0_50, %c0_51, %c0_52], %122 {strides = array<i32>} : memref<1x16x32xf32, #tpu.memory_space<vmem>>, vector<1x16x32xf32>,
    return
  }
  func.func @transform_0(%arg0: i32, %arg1: i32) -> (i32, i32, i32) {
    %c0_i32 = arith.constant 0 : i32
    %c0_i32_0 = arith.constant 0 : i32
    return %arg0, %arg1, %c0_i32 : i32, i32, i32
  }
  func.func @transform_1(%arg0: i32, %arg1: i32) -> (i32, i32, i32) {
    %c0_i32 = arith.constant 0 : i32
    %c0_i32_0 = arith.constant 0 : i32
    %c0_i32_1 = arith.constant 0 : i32
    return %arg0, %c0_i32, %c0_i32_0 : i32, i32, i32
  }
  func.func @transform_2(%arg0: i32, %arg1: i32) -> (i32, i32, i32) {
    %c0_i32 = arith.constant 0 : i32
    %c0_i32_0 = arith.constant 0 : i32
    %c0_i32_1 = arith.constant 0 : i32
    return %arg0, %c0_i32, %c0_i32_0 : i32, i32, i32
  }
  func.func @transform_3(%arg0: i32, %arg1: i32) -> (i32, i32) {
    %c0_i32 = arith.constant 0 : i32
    %c0_i32_0 = arith.constant 0 : i32
    %c0_i32_1 = arith.constant 0 : i32
    return %c0_i32, %c0_i32_0 : i32, i32
  }
  func.func @transform_4(%arg0: i32, %arg1: i32) -> (i32, i32) {
    %c0_i32 = arith.constant 0 : i32
    %c0_i32_0 = arith.constant 0 : i32
    %c0_i32_1 = arith.constant 0 : i32
    return %c0_i32, %c0_i32_0 : i32, i32
  }
  func.func @transform_5(%arg0: i32, %arg1: i32) -> (i32, i32) {
    %c0_i32 = arith.constant 0 : i32
    %c0_i32_0 = arith.constant 0 : i32
    %c0_i32_1 = arith.constant 0 : i32
    return %c0_i32, %c0_i32_0 : i32, i32
  }
  func.func @transform_6(%arg0: i32, %arg1: i32) -> (i32, i32) {
    %c0_i32 = arith.constant 0 : i32
    %c0_i32_0 = arith.constant 0 : i32
    %c0_i32_1 = arith.constant 0 : i32
    return %c0_i32, %c0_i32_0 : i32, i32
  }
  func.func @transform_7(%arg0: i32, %arg1: i32) -> (i32, i32) {
    %c0_i32 = arith.constant 0 : i32
    %c0_i32_0 = arith.constant 0 : i32
    %c0_i32_1 = arith.constant 0 : i32
    return %c0_i32, %c0_i32_0 : i32, i32
  }
  func.func @transform_8(%arg0: i32, %arg1: i32) -> (i32, i32) {
    %c0_i32 = arith.constant 0 : i32
    %c0_i32_0 = arith.constant 0 : i32
    %c0_i32_1 = arith.constant 0 : i32
    return %c0_i32, %c0_i32_0 : i32, i32
  }
  func.func @transform_9(%arg0: i32, %arg1: i32) -> (i32, i32, i32) {
    %c0_i32 = arith.constant 0 : i32
    %c0_i32_0 = arith.constant 0 : i32
    return %arg0, %arg1, %c0_i32 : i32, i32, i32
  }
  func.func @transform_10(%arg0: i32, %arg1: i32) -> (i32, i32, i32, i32) {
    %c0_i32 = arith.constant 0 : i32
    %c0_i32_0 = arith.constant 0 : i32
    %c0_i32_1 = arith.constant 0 : i32
    return %c0_i32, %arg0, %arg1, %c0_i32_0 : i32, i32, i32, i32
  }
}

</mosaic_0001>

<bundles_post_ra>
// kernel: tpu_custom_call.1
= control target key start
LH: loop header
LB: loop body
LE: loop exit
PB: predicated region body
PF: predicated region fallthrough
CT: control target
= control target key end

     0   :  { %s2743_s0 = inlined_call_operand.vmem [shape: f32[2,16,32], index: 0, kind: input, shape index: {}]   ;;  %s2744_s1 = inlined_call_operand.hbm [shape: f32[2,16,32], index: 1, kind: input, shape index: {}]   ;;  %s2745_s2 = inlined_call_operand.hbm [shape: f32[2,16,32], index: 2, kind: input, shape index: {}]   ;;  %s2746_s3 = inlined_call_operand.vmem [shape: bf16[32,64], index: 3, kind: input, shape index: {}]   ;;  %s2747_s4 = inlined_call_operand.hbm [shape: bf16[32,64], index: 4, kind: input, shape index: {}]   ;;  %s2748_s5 = inlined_call_operand.hbm [shape: bf16[32,64], index: 5, kind: input, shape index: {}]   ;;  %s2749_s6 = inlined_call_operand.vmem [shape: bf16[64,32], index: 6, kind: input, shape index: {}]   ;;  %s2750_s7 = inlined_call_operand.vmem [shape: f32[1,32], index: 7, kind: input, shape index: {}]   ;;  %s2751_s8 = inlined_call_operand.vmem [shape: f32[1,32], index: 8, kind: input, shape index: {}]   ;;  %s2752_s9 = inlined_call_operand.hbm [shape: f32[2,16,32], index: 9, kind: output, shape index: {0}]   ;;  %s2753_s10 = inlined_call_operand.hbm [shape: bf16[4,2,16,16], index: 10, kind: output, shape index: {1}]  }
   0x1   :  { %2763 = sst [smem:[#allocation29_spill]] %s2744_s1 }
   0x2   :  { %2764 = sst [smem:[#allocation30_spill]] %s2747_s4 }
   0x3   :  { %2765 = sst [smem:[#allocation31_spill]] %s2748_s5 }
   0x4   :  { %2766 = sst [smem:[#allocation32_spill]] %s2752_s9 }
   0x5   :  { %2767 = sst [smem:[#allocation33_spill]] %s2753_s10 }
   0x6   :  { %16 = vsyncpa [#allocation5], 0 }
   0x7   :  { %18 = vsyncpa [#allocation5 + $0x1], 0 }
   0x8   :  { %19 = vsyncpa [#allocation8], 0 }
   0x9   :  { %21 = vsyncpa [#allocation8 + $0x1], 0 }
   0xa   :  { %22 = vsyncpa [#allocation11], 0 }
   0xb   :  { %23 = vsyncpa [#allocation6], 0 }
   0xc   :  { %25 = vsyncpa [#allocation6 + $0x1], 0 }
   0xd   :  { %26 = vsyncpa [#allocation14], 0 }
   0xe   :  { %28 = vsyncpa [#allocation14 + $0x1], 0  ;;  %s2335_s13 = smov 0   ;;  %s2337_s14 = smov 0  }
   0xf   :  { %s2339_s15 = smov 0   ;;  %s2341_s16 = smov 0  }
  0x10   :  { %s2343_s17 = smov 0   ;;  %s2345_s18 = smov 0  }
  0x11 LB: > { %2768 = sst [smem:[#allocation23_spill]] %s2232_s13  ;;  %s2366_s19 = sadd.s32 4294967295, %s2252_s18   ;;  %s2252_s18 = sphi %s2345_s18, %s34_s18   ;;  %s2248_s17 = sphi %s2343_s17, %s2802_s17   ;;  %s2244_s16 = sphi %s2341_s16, %s2801_s16   ;;  %s2240_s15 = sphi %s2339_s15, %s2797_s15   ;;  %s2236_s14 = sphi %s2337_s14, %s2800_s14   ;;  %s2232_s13 = sphi %s2335_s13, %s2799_s13  }
  0x12   : > { %2769 = sst [smem:[#allocation24_spill]] %s2240_s15  ;;  %s1662_s20 = sadd.s32 4294967294, %s2252_s18  }
  0x13   : > { %p94_p0 = scmp.ne.s32.totalorder %s2236_s14, %s2232_s13  ;;  %p2754_p1 = scmp.eq.s32.totalorder %s2366_s19, 0 }
  0x14   : > { %p278_p3 = scmp.eq.s32.totalorder %s1662_s20, 1  ;;  %p1663_p5 = scmp.ge.s32.totalorder %s2252_s18, 1 }
  0x15   : > { %p2375_p4 = por %p2754_p1, %p94_p0  ;;  %p313_p7 = scmp.lt.s32.totalorder %s2252_s18, 3 }
  0x16   : > { %p2380_p6 = por %p278_p3, %p94_p0  ;;  %s2254_s24 = smov [#allocation9]  }
  0x17   : > { %p2385_p8 = pnand %p1663_p5, %p313_p7  ;;  %s328_s25 = sshll.u32 %s2254_s24, 4  ;;  %s329_s25 = int_to_ptr.vmem [resolvable:$true] %s328_s25 }
  0x18   : > { %s2771_s22 = scalar_select %p2380_p6, 1, 0 }
  0x19   : > { %p1887_p9 = pneg %p2385_p8  ;;  %s2255_s27 = smov [#allocation10]  }
  0x1a   : > { %2772 = sst [smem:[#allocation25_spill]] %s2771_s22  ;;  %s341_s28 = sshll.u32 %s2255_s27, 4  ;;  %s342_s28 = int_to_ptr.vmem [resolvable:$true] %s341_s28 }
  0x1b   : > { %p2394_p11 = pnand %p1887_p9, %p2754_p1  ;;  %s2059_s29 = scalar_lea.vmem %s329_s25, 256 }
  0x1c   : > { %p2060_p13 = scmp.ne.s32.totalorder %s329_s25, %s2059_s29  ;;  %p2067_p5 = scmp.lt.s32.totalorder %s329_s25, %s329_s25 }
  0x1d   : > { %p2050_p12 = pneg %p2394_p11  ;;  %p2068_p7 = scmp.lt.s32.totalorder %s2059_s29, %s2059_s29 }
  0x1f   : > { %p2062_p0 = pnand %p2060_p13, %p2050_p12  ;;  %p2069_p10 = por %p2068_p7, %p2067_p5 }
  0x21   : > { %p2063_p3 = pneg %p2062_p0 }
  0x23   : > { %p2070_p9 = pnand %p2069_p10, %p2063_p3 }
  0x25   : > { %2073 = shalt.err (!%p2070_p9)
}
  0x26   : > { %s2256_s30 = smov 64   ;;  %s2257_s11 = smov 4  }
  0x27   : > { %s2775_s4 = sld [smem:[#allocation30_spill]]  ;;  %s2085_s24 = scalar_lea.vmem %s342_s28, 256 }
  0x28   : > { %p2086_p1 = scmp.ne.s32.totalorder %s342_s28, %s2085_s24  ;;  %p2093_p2 = scmp.lt.s32.totalorder %s342_s28, %s342_s28 }
  0x29   : > { %p2094_p6 = scmp.lt.s32.totalorder %s2085_s24, %s2085_s24 }
  0x2a   : > { %p2088_p13 = pnand %p2086_p1, %p2050_p12 }
  0x2b   : > { %p2095_p5 = por %p2094_p6, %p2093_p2 }
  0x2c   : > { %p2089_p0 = pneg %p2088_p13 }
  0x2d   : > { %1890 = dma.hbm_to_vmem [thread:$0]  (!%p2394_p11), %s2775_s4, 256, %s329_s25, [#allocation8], %s2256_s30, %s2256_s30, %s2257_s11  }
  0x2e   : > { %p2096_p10 = pnand %p2095_p5, %p2089_p0 }
  0x30   : > { %2099 = shalt.err (!%p2096_p10)
}
  0x31   : > { %s2776_s5 = sld [smem:[#allocation31_spill]]  ;;  %s46_s25 = sadd.s32 1, %s2248_s17 }
  0x32   : > { %s81_s12 = sadd.s32 1, %s2240_s15  ;;  %p48_p1 = scmp.ge.s32.totalorder %s46_s25, 2 }
  0x33   : > { %p88_p2 = scmp.ne.s32.totalorder %s2240_s15, %s2236_s14  ;;  %p89_p6 = scmp.eq.s32.totalorder %s2252_s18, 0 }
  0x34   : > { %p1910_p12 = scmp.lt.s32.totalorder %s2252_s18, 2  ;;  %s2804_s25 = smov (%p48_p1, %s46_s25), 0 }
  0x35   : > { %2777 = sst [smem:[#allocation26_spill]] %s2804_s25  ;;  %p90_p3 = por %p89_p6, %p88_p2 }
  0x36   : > { %p2778_p7 = scmp.eq.s32.totalorder %s2366_s19, 1  ;;  %s78_s20 = ssub.s32 %s2248_s17, %s2804_s25 }
  0x37   : > { %1893 = dma.hbm_to_vmem [thread:$0]  (!%p2394_p11), %s2776_s5, 256, %s342_s28, [#allocation11], %s2256_s30, %s2256_s30, %s2257_s11  }
  0x38   : > { %p2426_p9 = por %p2778_p7, %p88_p2  ;;  %s377_s24 = sand.u32 1, %s2240_s15  }
  0x39   : > { %p79_p11 = scmp.eq.s32.totalorder %s78_s20, 0  ;;  %s2433_s28 = sshll.u32 %s377_s24, 4 }
  0x3a   : > { %s2779_s26 = scalar_select %p2426_p9, 1, 0 }
  0x3b   : > { %s2757_s30 = sshll.u32 %s2248_s17, 8  ;;  %s2782_s1 = sld [smem:[#allocation29_spill]] }
  0x3c   : > { %2780 = sst [smem:[#allocation27_spill]] %s2779_s26  ;;  %s381_s5 = scalar_lea.vmem [#allocation4], %s2433_s28 }
  0x3d   : > { %s2437_s11 = scalar_select %p79_p11, %s2240_s15, %s81_s12  }
  0x3e   : > { %s388_s22 = sshll.u32 %s381_s5, 4  ;;  %p2447_p13 = pnand %p1910_p12, %p90_p3  ;;  %s389_s22 = int_to_ptr.vmem [resolvable:$true] %s388_s22 }
  0x3f   : > { %2781 = sst [smem:[#allocation28_spill]] %s2437_s11  ;;  %s378_s20 = scalar_lea.sflag [#allocation5], %s377_s24 }
  0x40   : > { %p2102_p0 = pneg %p2447_p13  ;;  %s2113_s12 = scalar_lea.vmem %s389_s22, 256 }
  0x41   : > { %s387_s4 = scalar_lea.hbm %s2782_s1, %s2757_s30  ;;  %p2114_p5 = scmp.ne.s32.totalorder %s389_s22, %s2113_s12 }
  0x42   : > { %s2258_s27 = smov [#allocation4]  }
  0x43   : > { %p2116_p10 = pnand %p2114_p5, %p2102_p0  ;;  %s2118_s29 = sshll.u32 %s2258_s27, 4  ;;  %s2119_s29 = int_to_ptr.vmem [resolvable:$false] %s2118_s29 }
  0x44   : > { %s2120_s5 = scalar_lea.vmem %s2119_s29, 512  ;;  %p2121_p2 = scmp.lt.s32.totalorder %s389_s22, %s2119_s29 }
  0x45   : > { %p2117_p1 = pneg %p2116_p10  ;;  %p2122_p6 = scmp.lt.s32.totalorder %s2120_s5, %s2113_s12 }
  0x47   : > { %p2123_p12 = por %p2122_p6, %p2121_p2 }
  0x49   : > { %p2124_p3 = pnand %p2123_p12, %p2117_p1 }
  0x4b   : > { %2127 = shalt.err (!%p2124_p3)
}
  0x4c   : > { %s2259_s30 = smov 128   ;;  %s2260_s24 = smov 8  }
  0x4d   : > { %1897 = dma.hbm_to_vmem [thread:$0]  (!%p2447_p13), %s387_s4, 256, %s389_s22, %s378_s20, %s2259_s30, %s2259_s30, %s2260_s24  }
  0x4e   : > { %s2784_s1 = sshll.u32 %s2248_s17, 8  ;;  %s402_s15 = scalar_lea.vmem [#allocation7], %s2433_s28 }
  0x4f   : > { %s408_s27 = scalar_lea.hbm %s2745_s2, %s2784_s1  ;;  %s409_s29 = sshll.u32 %s402_s15, 4  ;;  %s410_s29 = int_to_ptr.vmem [resolvable:$true] %s409_s29 }
  0x50   : > { %s398_s12 = sand.u32 1, %s2252_s18   ;;  %s2141_s10 = scalar_lea.vmem %s410_s29, 256 }
  0x51   : > { %s399_s5 = scalar_lea.sflag [#allocation8], %s398_s12  ;;  %p2142_p7 = scmp.ne.s32.totalorder %s410_s29, %s2141_s10 }
  0x52   : > { %s2261_s9 = smov [#allocation7]  }
  0x53   : > { %p2144_p11 = pnand %p2142_p7, %p2102_p0  ;;  %s2146_s26 = sshll.u32 %s2261_s9, 4  ;;  %s2147_s26 = int_to_ptr.vmem [resolvable:$false] %s2146_s26 }
  0x54   : > { %s2148_s4 = scalar_lea.vmem %s2147_s26, 512  ;;  %p2149_p10 = scmp.lt.s32.totalorder %s410_s29, %s2147_s26 }
  0x55   : > { %p2145_p5 = pneg %p2144_p11  ;;  %p2150_p1 = scmp.lt.s32.totalorder %s2148_s4, %s2141_s10 }
  0x57   : > { %p2151_p2 = por %p2150_p1, %p2149_p10 }
  0x59   : > { %p2152_p6 = pnand %p2151_p2, %p2145_p5 }
  0x5b   : > { %2155 = shalt.err (!%p2152_p6)
}
  0x5c   : > { %1900 = dma.hbm_to_vmem [thread:$0]  (!%p2447_p13), %s408_s27, 256, %s410_s29, %s399_s5, %s2259_s30, %s2259_s30, %s2260_s24  }
  0x5d   : > { %421 = sbr.rel (%p2385_p8) target bundleno = 1826 (0x722), region = 56  ;;  %s2473_s1 = sand.u32 (!%p2385_p8), 1, %s2236_s14  }
  0x5e   : > { %s2476_s9 = sshll.u32 (!%p2385_p8), %s2473_s1, 4  ;;  %s424_s15 = scalar_lea.sflag (!%p2385_p8), [#allocation5], %s2473_s1 }
  0x5f   : > { %s427_s10 = scalar_lea.vmem (!%p2385_p8), [#allocation4], %s2476_s9 }
  0x62   : > { %2207 = dma.done.wait (%p2375_p4), %s424_s15, 256  }
  0x63   : > { %2209 = vsyncadd (%p2375_p4), %s424_s15, 4294967040  ;;  %s432_s13 = sand.u32 1, %s2366_s19   ;;  %s436_s23 = scalar_lea.vmem [#allocation7], %s2476_s9 }
  0x64   : > { %s433_s22 = scalar_lea.sflag [#allocation8], %s432_s13 }
  0x65   : > { %2211 = dma.done.wait (%p2375_p4), %s433_s22, 256  }
  0x66   : > { %2213 = vsyncadd (%p2375_p4), %s433_s22, 4294967040  ;;  %p2785_p8 = scmp.eq.s32.totalorder %s2366_s19, 0 }
  0x68   : > { %2215 = dma.done.wait (%p2785_p8), [#allocation8], 256   ;;  %p2786_p13 = pmov %p2785_p8 }
  0x69   : > { %p2787_p0 = pmov %p2785_p8 }
  0x6a   : > { %2217 = vsyncadd (%p2786_p13), [#allocation8], 4294967040 }
  0x6b   : > { %2219 = dma.done.wait (%p2787_p0), [#allocation11], 256   ;;  %p2788_p12 = pmov %p2787_p0 }
  0x6c   : > { %v2262_v0 = vmov 0.0   ;;  %vm2263_vm0 = vmmov 0   ;;  %p501_p4 = scmp.lt.s32.totalorder %s2244_s16, 1  ;;  %v2000_v1 = vld [vmem:[#allocation9 + $0x8] sm:$0xff]   ;;  %v2001_v2 = vld [vmem:[#allocation9] sm:$0xff]   ;;  %vm539_vm1 = vcmask 261120  }
  0x6d   : > { %2221 = vsyncadd (%p2788_p12), [#allocation11], 4294967040  ;;  %1781 = vmatprep.subr.bf16.mxu0 %v2262_v0  ;;  %1785 = vmatprep.mubr.msk.bf16.mxu0 %vm2263_vm0, %v2262_v0  ;;  %v517_v3 = vld [vmem:[%s427_s10] sm:$0xff]  ;;  %v518_v4 = vld [vmem:[%s427_s10 + $0x8] sm:$0xff]  ;;  %vm592_vm2 = vcmask 519168   ;;  %vm739_vm3 = vcmask 130048  }
  0x6e   : > { %1789 = vmatprep.subr.bf16.mxu1 %v2262_v0  ;;  %1793 = vmatprep.mubr.msk.bf16.mxu1 %vm2263_vm0, %v2262_v0  ;;  %s502_s21 = scalar_select %p501_p4, %s2244_s16, 1  ;;  %v519_v5 = vpack.c.bf16 %v518_v4, %v517_v3  ;;  %v2002_v6 = vld [vmem:[%s2746_s3 + $0x8] sm:$0xff]   ;;  %v2003_v7 = vld [vmem:[%s2746_s3] sm:$0xff]   ;;  %vm817_vm4 = vcmask 125952   ;;  %vm1292_vm5 = vcmask 392192   ;;  %vm1328_vm6 = vcmask 523264  }
  0x6f   : > { %1782 = vmatpush3.bf16.msra.mxu0 %v2000_v1  ;;  %v2004_v11 = vld [vmem:[#allocation10 + $0x8] sm:$0xff]   ;;  %v2005_v12 = vld [vmem:[#allocation10] sm:$0xff]   ;;  %s2264_s27 = smov 96   ;;  %s2265_s29 = smov 112  }
  0x70   : > { %1783 = vmatprep.subr.bf16.mxu0 %v2262_v0  ;;  %s1736_s19 = sshll.u32 %s502_s21, 4  ;;  %1790 = vmatpush3.bf16.msra.mxu1 %v2004_v11  ;;  %v520_v13 = vld [vmem:[%s436_s23] sm:$0xff]  ;;  %v521_v14 = vld [vmem:[%s436_s23 + $0x8] sm:$0xff]  ;;  %s2266_s12 = smov 80  }
  0x71   : > { %s508_s11 = scalar_lea.vmem %s2743_s0, %s1736_s19  ;;  %1791 = vmatprep.subr.bf16.mxu1 %v2262_v0  ;;  %v522_v15 = vpack.c.bf16 %v521_v14, %v520_v13  ;;  %s1679_s5 = sshll.u32 %s2473_s1, 5 }
  0x72   : > { %v2520_v8 = vld [vmem:[%s508_s11] sm:$0xff]  ;;  %v2522_v9 = vld [vmem:[%s508_s11 + $0x8] sm:$0xff]  ;;  %s2603_s4 = scalar_lea.vmem [#allocation13], %s1679_s5  ;;  %s2267_s19 = smov 16  }
  0x73   : > { %1784 = vmatpush3.bf16.msra.mxu0 %v2001_v2  ;;  %v667_v10 = vpack.c.bf16 %v2522_v9, %v2520_v8  ;;  %s2268_s28 = smov 32   ;;  %s2269_s30 = smov 48  }
  0x74   : > { %1797 = vmatprep.subr.bf16.mxu0 %v2262_v0  ;;  %1792 = vmatpush3.bf16.msra.mxu1 %v2005_v12  ;;  %s492_s5 = scalar_lea.vmem [#allocation12], %s2476_s9  ;;  %s2790_s22 = sld [smem:[#allocation32_spill]] }
  0x75   : > { %1805 = vmatprep.subr.bf16.mxu1 %v2262_v0  ;;  %s1441_s15 = sshll.u32 %s492_s5, 4  ;;  %s1421_s21 = scalar_lea.sflag [#allocation6], %s2473_s1  ;;  %s2674_s15 = int_to_ptr.vmem [resolvable:$true] %s1441_s15 }
  0x76   : > { %1786 = vmatmul.mubr.msk.bf16.vlgmr.msra.gmra.mxu0 %vm539_vm1, %v519_v5  ;;  %s2270_s9 = smov [#allocation12]  }
  0x77   : > { %1798 = vmatpush3.bf16.msra.mxu0 %v2002_v6  ;;  %1801 = vmatprep.mubr.msk.bf16.mxu0 %vm2263_vm0, %v2262_v0  ;;  %s2160_s25 = sshll.u32 %s2270_s9, 4  ;;  %s2161_s25 = int_to_ptr.vmem [resolvable:$false] %s2160_s25 }
  0x78   : > { %1799 = vmatprep.subr.bf16.mxu0 %v2262_v0  ;;  %1794 = vmatmul.mubr.msk.bf16.vlgmr.msra.gmra.mxu1 %vm539_vm1, %v522_v15  ;;  %s2162_s26 = scalar_lea.vmem %s2161_s25, 512  ;;  %p2163_p5 = scmp.lt.s32.totalorder %s2674_s15, %s2161_s25 }
  0x79   : > { %1807 = vmatprep.mubr.msk.bf16.mxu1 %vm2263_vm0, %v2262_v0 }
  0x7b   : > { %1800 = vmatpush3.bf16.msra.mxu0 %v2003_v7 }
  0x7c   : > { %1811 = vmatprep.subr.bf16.mxu0 %v2262_v0 }
  0x7e   : > { %1802 = vmatmul.mubr.msk.bf16.vlgmr.msra.gmra.mxu0 %vm539_vm1, %v667_v10 }
  0x7f   : > { %1813 = vmatprep.mubr.msk.bf16.mxu0 %vm2263_vm0, %v2262_v0 }
 0x136   : > { %v577_v16 = vpop.f32.mrf.mxu0 }
 0x137   : > { %v1737_v17 = vpack.c.bf16 %v577_v16, %v577_v16 }
 0x138   : > { %v1787_v18 = vpop.f32.mrf.mxu0  ;;  %v648_v29 = vpop.f32.mrf.mxu1 }
 0x139   : > { %593 = vst.msk [vmem:[#allocation2] sm:$0xf] %vm592_vm2, %v1737_v17  ;;  %v1739_v30 = vpack.c.bf16 %v648_v29, %v648_v29 }
 0x13a   : > { %v580_v19 = vpop.f32.mrf.mxu0  ;;  %v1795_v31 = vpop.f32.mrf.mxu1 }
 0x13b   : > { %v1738_v20 = vpack.c.bf16 %v580_v19, %v580_v19  ;;  %663 = vst.msk [vmem:[#allocation3] sm:$0xf] %vm592_vm2, %v1739_v30 }
 0x13c   : > { %v1788_v21 = vpop.f32.mrf.mxu0  ;;  %v651_v32 = vpop.f32.mrf.mxu1 }
 0x13d   : > { %594 = vst.msk [vmem:[#allocation2 + $0x4] sm:$0xf] %vm592_vm2, %v1738_v20  ;;  %v1740_v33 = vpack.c.bf16 %v651_v32, %v651_v32 }
 0x13e   : > { %v722_v22 = vpop.f32.mrf.mxu0  ;;  %v1796_v34 = vpop.f32.mrf.mxu1 }
 0x13f   : > { %664 = vst.msk [vmem:[#allocation3 + $0x4] sm:$0xf] %vm592_vm2, %v1740_v33 }
 0x140   : > { %v1803_v23 = vpop.f32.mrf.mxu0 }
 0x142   : > { %v725_v24 = vpop.f32.mrf.mxu0 }
 0x143   : > { %v729_v27 = vpack.c.bf16 %v725_v24, %v722_v22 }
 0x144   : > { %v2006_v25 = vld [vmem:[#allocation2] sm:$0xff]   ;;  %v1804_v26 = vpop.f32.mrf.mxu0 }
 0x145   : > { %1004 = vrot.lane.b32.xlu1 %v2006_v25, %s2264_s27  ;;  %873 = vrot.lane.b32.xlu0 %v2006_v25, %s2265_s29  ;;  %v744_v28 = vsel %vm739_vm3, %v2006_v25, 0 }
 0x146   : > { %1806 = vmatpush3.bf16.xpose.msra.mxu1 %v744_v28  ;;  %v2555_v35 = vld [vmem:[#allocation3] sm:$0xff]  }
 0x147   : > { %1817 = vmatprep.subr.bf16.mxu1 %v2262_v0  ;;  %1812 = vmatpush3.bf16.msra.mxu0 %v2555_v35 }
 0x148   : > { %1823 = vmatprep.subr.bf16.mxu0 %v2262_v0 }
 0x149   : > { %1002 = vrot.lane.b32.xlu1 %v729_v27, %s2264_s27  ;;  %871 = vrot.lane.b32.xlu0 %v729_v27, %s2265_s29 }
 0x14d   : > { %1133 = vrot.lane.b32.xlu1 %v729_v27, %s2266_s12  ;;  %1135 = vrot.lane.b32.xlu0 %v2006_v25, %s2266_s12 }
 0x14e   : > { %1808 = vmatmul.mubr.msk.bf16.vlgmr.msra.gmra.mxu1 %vm739_vm3, %v729_v27 }
 0x14f   : > { %1819 = vmatprep.mubr.msk.bf16.mxu1 %vm2263_vm0, %v2262_v0 }
 0x1b7   : > { %v874_v36 = vpop.permute.xlu0 %873  ;;  %v1005_v38 = vpop.permute.xlu1 %1004 }
 0x1b8   : > { %v879_v37 = vsel %vm739_vm3, %v874_v36, 0  ;;  %v1010_v40 = vsel %vm739_vm3, %v1005_v38, 0 }
 0x1b9   : > { %1818 = vmatpush3.bf16.xpose.msra.mxu1 %v879_v37 }
 0x1ba   : > { %1829 = vmatprep.subr.bf16.mxu1 %v2262_v0 }
 0x1bb   : > { %v872_v39 = vpop.permute.xlu0 %871  ;;  %v1003_v42 = vpop.permute.xlu1 %1002 }
 0x1bf   : > { %v1136_v41 = vpop.permute.xlu0 %1135  ;;  %v1134_v44 = vpop.permute.xlu1 %1133 }
 0x1c0   : > { %1820 = vmatmul.mubr.msk.bf16.vlgmr.msra.gmra.mxu1 %vm739_vm3, %v872_v39  ;;  %v1141_v43 = vsel %vm739_vm3, %v1136_v41, 0 }
 0x1c1   : > { %1830 = vmatpush3.bf16.xpose.msra.mxu1 %v1010_v40  ;;  %1831 = vmatprep.mubr.msk.bf16.mxu1 %vm2263_vm0, %v2262_v0 }
 0x1c2   : > { %1841 = vmatprep.subr.bf16.mxu1 %v2262_v0 }
 0x1c8   : > { %1832 = vmatmul.mubr.msk.bf16.vlgmr.msra.gmra.mxu1 %vm739_vm3, %v1003_v42 }
 0x1c9   : > { %1842 = vmatpush3.bf16.xpose.msra.mxu1 %v1141_v43  ;;  %1843 = vmatprep.mubr.msk.bf16.mxu1 %vm2263_vm0, %v2262_v0 }
 0x1ca   : > { %1853 = vmatprep.subr.bf16.mxu1 %v2262_v0 }
 0x1d0   : > { %1844 = vmatmul.mubr.msk.bf16.vlgmr.msra.gmra.mxu1 %vm739_vm3, %v1134_v44 }
 0x1d1   : > { %1861 = vmatprep.mubr.msk.bf16.mxu1 %vm2263_vm0, %v2262_v0 }
 0x20e   : > { %v780_v45 = vpop.f32.mrf.mxu1 }
 0x20f   : > { %v787_v46 = vsel %vm739_vm3, %v780_v45, -inf }
 0x210   : > { %788 = vmax.xlane.f32.xlu0 %v787_v46  ;;  %v1809_v47 = vpop.f32.mrf.mxu1 }
 0x212   : > { %v783_v48 = vpop.f32.mrf.mxu1 }
 0x213   : > { %v790_v49 = vsel %vm739_vm3, %v783_v48, -inf }
 0x214   : > { %791 = vmax.xlane.f32.xlu1 %v790_v49  ;;  %v1810_v50 = vpop.f32.mrf.mxu1 }
 0x280   : > { %v915_v51 = vpop.f32.mrf.mxu1 }
 0x281   : > { %v922_v52 = vsel %vm739_vm3, %v915_v51, -inf }
 0x282   : > { %923 = vmax.xlane.f32.xlu0 %v922_v52  ;;  %v1821_v53 = vpop.f32.mrf.mxu1 }
 0x284   : > { %v918_v54 = vpop.f32.mrf.mxu1 }
 0x285   : > { %v925_v55 = vsel %vm739_vm3, %v918_v54, -inf }
 0x286   : > { %926 = vmax.xlane.f32.xlu0 %v925_v55  ;;  %v1822_v56 = vpop.f32.mrf.mxu1 }
 0x288   : > { %v1046_v57 = vpop.f32.mrf.mxu1 }
 0x289   : > { %v1053_v58 = vsel %vm739_vm3, %v1046_v57, -inf }
 0x28a   : > { %1054 = vmax.xlane.f32.xlu1 %v1053_v58  ;;  %v1833_v59 = vpop.f32.mrf.mxu1 }
 0x28c   : > { %v1049_v60 = vpop.f32.mrf.mxu1 }
 0x28d   : > { %v1056_v61 = vsel %vm739_vm3, %v1049_v60, -inf }
 0x28e   : > { %1057 = vmax.xlane.f32.xlu0 %v1056_v61  ;;  %v1834_v62 = vpop.f32.mrf.mxu1 }
 0x290   : > { %v1177_v63 = vpop.f32.mrf.mxu1 }
 0x291   : > { %v1184_v1 = vsel %vm739_vm3, %v1177_v63, -inf }
 0x292   : > { %1185 = vmax.xlane.f32.xlu1 %v1184_v1  ;;  %v1845_v2 = vpop.f32.mrf.mxu1 }
 0x294   : > { %v1180_v3 = vpop.f32.mrf.mxu1 }
 0x295   : > { %v1187_v4 = vsel %vm739_vm3, %v1180_v3, -inf }
 0x296   : > { %1188 = vmax.xlane.f32.xlu0 %v1187_v4  ;;  %v1846_v5 = vpop.f32.mrf.mxu1 }
 0x299   : > { %v789_v6 = vpop.xlane.xlu0 %788 }
 0x29a   : > { %v793_v7 = vsub.f32 %v780_v45, %v789_v6 }
 0x29c   : > { %v795_v10 = vmul.f32 1.442695, %v793_v7 }
 0x29d   : > { %v792_v11 = vpop.xlane.xlu1 %791 }
 0x29e   : > { %2012 = vpow2.f32 %v795_v10  ;;  %v794_v12 = vsub.f32 %v783_v48, %v792_v11 }
 0x2a0   : > { %v797_v13 = vmul.f32 1.442695, %v794_v12 }
 0x2a2   : > { %2014 = vpow2.f32 %v797_v13 }
 0x2ab   : > { %v2013_v14 = vpop.eup %2012 }
 0x2ac   : > { %v799_v15 = vsel %vm739_vm3, %v2013_v14, 0.0 }
 0x2ad   : > { %800 = vadd.xlane.f32.xlu1 %v799_v15 }
 0x2af   : > { %v2015_v16 = vpop.eup %2014 }
 0x2b0   : > { %v802_v17 = vsel %vm739_vm3, %v2015_v16, 0.0 }
 0x2b1   : > { %803 = vadd.xlane.f32.xlu0 %v802_v17 }
 0x2be   : > { %955 = vrot.lane.b32.xlu1 %v2555_v35, %s2265_s29 }
 0x30b   : > { %v924_v18 = vpop.xlane.xlu0 %923 }
 0x30c   : > { %v928_v19 = vsub.f32 %v915_v51, %v924_v18 }
 0x30e   : > { %v930_v20 = vmul.f32 1.442695, %v928_v19 }
 0x30f   : > { %v927_v21 = vpop.xlane.xlu0 %926 }
 0x310   : > { %2016 = vpow2.f32 %v930_v20  ;;  %v929_v22 = vsub.f32 %v918_v54, %v927_v21 }
 0x312   : > { %v932_v23 = vmul.f32 1.442695, %v929_v22 }
 0x313   : > { %v1055_v24 = vpop.xlane.xlu1 %1054 }
 0x314   : > { %2018 = vpow2.f32 %v932_v23  ;;  %v1059_v25 = vsub.f32 %v1046_v57, %v1055_v24 }
 0x316   : > { %v1061_v26 = vmul.f32 1.442695, %v1059_v25 }
 0x317   : > { %v1058_v27 = vpop.xlane.xlu0 %1057 }
 0x318   : > { %2020 = vpow2.f32 %v1061_v26  ;;  %v1060_v28 = vsub.f32 %v1049_v60, %v1058_v27 }
 0x31a   : > { %v1063_v29 = vmul.f32 1.442695, %v1060_v28 }
 0x31b   : > { %v1186_v30 = vpop.xlane.xlu1 %1185 }
 0x31c   : > { %2022 = vpow2.f32 %v1063_v29  ;;  %v1190_v31 = vsub.f32 %v1177_v63, %v1186_v30  ;;  %v2008_v30 = vld [vmem:[%s2749_s6 + $0x18] sm:$0xff]  }
 0x31d   : > { %v2017_v32 = vpop.eup %2016  ;;  %1854 = vmatpush3.bf16.msra.mxu1 %v2008_v30 }
 0x31e   : > { %v1192_v33 = vmul.f32 1.442695, %v1190_v31  ;;  %v934_v34 = vsel %vm739_vm3, %v2017_v32, 0.0  ;;  %1855 = vmatprep.subr.bf16.mxu1 %v2262_v0 }
 0x31f   : > { %935 = vadd.xlane.f32.xlu1 %v934_v34  ;;  %v1189_v36 = vpop.xlane.xlu0 %1188  ;;  %v2009_v34 = vld [vmem:[%s2749_s6 + $0x10] sm:$0xff]  }
 0x320   : > { %2024 = vpow2.f32 %v1192_v33  ;;  %v1191_v37 = vsub.f32 %v1180_v3, %v1189_v36 }
 0x321   : > { %v2019_v38 = vpop.eup %2018  ;;  %1856 = vmatpush3.bf16.msra.mxu1 %v2009_v34 }
 0x322   : > { %v1194_v39 = vmul.f32 1.442695, %v1191_v37  ;;  %v937_v40 = vsel %vm739_vm3, %v2019_v38, 0.0  ;;  %1857 = vmatprep.subr.bf16.mxu1 %v2262_v0 }
 0x323   : > { %938 = vadd.xlane.f32.xlu0 %v937_v40 }
 0x324   : > { %2026 = vpow2.f32 %v1194_v39 }
 0x325   : > { %v2021_v41 = vpop.eup %2020 }
 0x326   : > { %v1065_v42 = vsel %vm739_vm3, %v2021_v41, 0.0 }
 0x327   : > { %1066 = vadd.xlane.f32.xlu1 %v1065_v42  ;;  %v2011_v42 = vld [vmem:[%s2749_s6] sm:$0xff]  }
 0x329   : > { %v2023_v43 = vpop.eup %2022 }
 0x32a   : > { %v1068_v44 = vsel %vm739_vm3, %v2023_v43, 0.0 }
 0x32b   : > { %1069 = vadd.xlane.f32.xlu0 %v1068_v44 }
 0x32d   : > { %v2590_v45 = vpop.eup %2024 }
 0x32e   : > { %v1196_v46 = vsel %vm739_vm3, %v2590_v45, 0.0 }
 0x32f   : > { %1197 = vadd.xlane.f32.xlu1 %v1196_v46 }
 0x331   : > { %v2594_v47 = vpop.eup %2026 }
 0x332   : > { %v1199_v48 = vsel %vm739_vm3, %v2594_v47, 0.0 }
 0x333   : > { %1200 = vadd.xlane.f32.xlu0 %v1199_v48 }
 0x336   : > { %v801_v49 = vpop.xlane.xlu1 %800 }
 0x337   : > { %2028 = vrcp.f32 %v801_v49 }
 0x33a   : > { %v804_v50 = vpop.xlane.xlu0 %803  ;;  %v956_v58 = vpop.permute.xlu1 %955 }
 0x33b   : > { %2030 = vrcp.f32 %v804_v50 }
 0x340   : > { %1217 = vrot.lane.b32.xlu1 %v2555_v35, %s2266_s12  ;;  %s1749_s12 = sshll.u32 %s2244_s16, 8 }
 0x341   : > { %s2672_s23 = scalar_lea.hbm %s2790_s22, %s1749_s12 }
 0x344   : > { %v2029_v51 = vpop.eup %2028 }
 0x345   : > { %v807_v52 = vmul.f32 %v2029_v51, %v2013_v14 }
 0x347   : > { %v1741_v53 = vpack.c.bf16 %v807_v52, %v807_v52 }
 0x348   : > { %v2031_v54 = vpop.eup %2030 }
 0x349   : > { %1086 = vrot.lane.b32.xlu0 %v2555_v35, %s2264_s27  ;;  %v808_v55 = vmul.f32 %v2031_v54, %v2015_v16  ;;  %818 = vst.msk [vmem:[%s2603_s4] sm:$0xf] %vm817_vm4, %v1741_v53 }
 0x34b   : > { %v809_v56 = vpack.c.bf16 %v808_v55, %v807_v52  ;;  %v1742_v57 = vpack.c.bf16 %v808_v55, %v808_v55 }
 0x34d   : > { %819 = vst.msk [vmem:[%s2603_s4 + $0x4] sm:$0xf] %vm817_vm4, %v1742_v57  ;;  %1814 = vmatmul.mubr.msk.bf16.vlgmr.msra.gmra.mxu0 %vm739_vm3, %v809_v56 }
 0x34e   : > { %1824 = vmatpush3.bf16.msra.mxu0 %v956_v58  ;;  %1825 = vmatprep.mubr.msk.bf16.mxu0 %vm2263_vm0, %v2262_v0 }
 0x34f   : > { %1835 = vmatprep.subr.bf16.mxu0 %v2262_v0 }
 0x3a8   : > { %v936_v35 = vpop.xlane.xlu1 %935 }
 0x3a9   : > { %2032 = vrcp.f32 %v936_v35 }
 0x3ac   : > { %v939_v59 = vpop.xlane.xlu0 %938 }
 0x3ad   : > { %2034 = vrcp.f32 %v939_v59 }
 0x3b0   : > { %v1067_v60 = vpop.xlane.xlu1 %1066 }
 0x3b1   : > { %2036 = vrcp.f32 %v1067_v60 }
 0x3b4   : > { %v1070_v61 = vpop.xlane.xlu0 %1069 }
 0x3b5   : > { %2038 = vrcp.f32 %v1070_v61 }
 0x3b6   : > { %v2033_v62 = vpop.eup %2032 }
 0x3b7   : > { %v942_v63 = vmul.f32 %v2033_v62, %v2017_v32 }
 0x3b8   : > { %v1198_v1 = vpop.xlane.xlu1 %1197 }
 0x3b9   : > { %2040 = vrcp.f32 %v1198_v1  ;;  %v1743_v2 = vpack.c.bf16 %v942_v63, %v942_v63 }
 0x3ba   : > { %v2035_v3 = vpop.eup %2034 }
 0x3bb   : > { %v943_v4 = vmul.f32 %v2035_v3, %v2019_v38  ;;  %1704 = vst.msk [vmem:[%s2603_s4 + $0x8] sm:$0xf] %vm817_vm4, %v1743_v2  ;;  %v2010_v38 = vld [vmem:[%s2749_s6 + $0x8] sm:$0xff]  }
 0x3bc   : > { %v1201_v5 = vpop.xlane.xlu0 %1200  ;;  %v1218_v19 = vpop.permute.xlu1 %1217  ;;  %1858 = vmatpush3.bf16.msra.mxu1 %v2010_v38 }
 0x3bd   : > { %2042 = vrcp.f32 %v1201_v5  ;;  %v944_v6 = vpack.c.bf16 %v943_v4, %v942_v63  ;;  %v1744_v7 = vpack.c.bf16 %v943_v4, %v943_v4  ;;  %1859 = vmatprep.subr.bf16.mxu1 %v2262_v0 }
 0x3be   : > { %v2037_v10 = vpop.eup %2036 }
 0x3bf   : > { %1705 = vst.msk [vmem:[%s2603_s4 + $0xc] sm:$0xf] %vm817_vm4, %v1744_v7  ;;  %1826 = vmatmul.mubr.msk.bf16.vlgmr.msra.gmra.mxu0 %vm739_vm3, %v944_v6  ;;  %v1073_v11 = vmul.f32 %v2037_v10, %v2021_v41 }
 0x3c0   : > { %v1087_v12 = vpop.permute.xlu0 %1086  ;;  %1837 = vmatprep.mubr.msk.bf16.mxu0 %vm2263_vm0, %v2262_v0  ;;  %1860 = vmatpush3.bf16.msra.mxu1 %v2011_v42 }
 0x3c1   : > { %1836 = vmatpush3.bf16.msra.mxu0 %v1087_v12  ;;  %v1745_v13 = vpack.c.bf16 %v1073_v11, %v1073_v11 }
 0x3c2   : > { %v2039_v14 = vpop.eup %2038  ;;  %1847 = vmatprep.subr.bf16.mxu0 %v2262_v0 }
 0x3c3   : > { %v1074_v15 = vmul.f32 %v2039_v14, %v2023_v43  ;;  %1710 = vst.msk [vmem:[%s2603_s4 + $0x10] sm:$0xf] %vm817_vm4, %v1745_v13 }
 0x3c5   : > { %v1075_v16 = vpack.c.bf16 %v1074_v15, %v1073_v11  ;;  %v1746_v17 = vpack.c.bf16 %v1074_v15, %v1074_v15 }
 0x3c6   : > { %v2041_v18 = vpop.eup %2040 }
 0x3c7   : > { %1711 = vst.msk [vmem:[%s2603_s4 + $0x14] sm:$0xf] %vm817_vm4, %v1746_v17  ;;  %1838 = vmatmul.mubr.msk.bf16.vlgmr.msra.gmra.mxu0 %vm739_vm3, %v1075_v16  ;;  %v1204_v20 = vmul.f32 %v2041_v18, %v2590_v45 }
 0x3c8   : > { %1848 = vmatpush3.bf16.msra.mxu0 %v1218_v19  ;;  %1849 = vmatprep.mubr.msk.bf16.mxu0 %vm2263_vm0, %v2262_v0 }
 0x3c9   : > { %v1747_v21 = vpack.c.bf16 %v1204_v20, %v1204_v20 }
 0x3ca   : > { %v2043_v22 = vpop.eup %2042 }
 0x3cb   : > { %v1205_v23 = vmul.f32 %v2043_v22, %v2594_v47  ;;  %1716 = vst.msk [vmem:[%s2603_s4 + $0x18] sm:$0xf] %vm817_vm4, %v1747_v21 }
 0x3cd   : > { %v1206_v24 = vpack.c.bf16 %v1205_v23, %v1204_v20  ;;  %v1748_v25 = vpack.c.bf16 %v1205_v23, %v1205_v23 }
 0x3cf   : > { %1717 = vst.msk [vmem:[%s2603_s4 + $0x1c] sm:$0xf] %vm817_vm4, %v1748_v25  ;;  %1850 = vmatmul.mubr.msk.bf16.vlgmr.msra.gmra.mxu0 %vm739_vm3, %v1206_v24 }
 0x40d   : > { %v863_v26 = vpop.f32.mrf.mxu0 }
 0x40f   : > { %v1815_v27 = vpop.f32.mrf.mxu0 }
 0x411   : > { %v866_v28 = vpop.f32.mrf.mxu0 }
 0x413   : > { %v1816_v29 = vpop.f32.mrf.mxu0 }
 0x47f   : > { %v995_v31 = vpop.f32.mrf.mxu0 }
 0x481   : > { %v1827_v32 = vpop.f32.mrf.mxu0 }
 0x483   : > { %v998_v33 = vpop.f32.mrf.mxu0 }
 0x484   : > { %v1985_v36 = vpack.i.bf16 %v998_v33, %v995_v31 }
 0x485   : > { %v1828_v37 = vpop.f32.mrf.mxu0 }
 0x486   : > { %1986 = vrot.lane.b32.xlu1 %v1985_v36, %s2267_s19  ;;  %s2156_s19 = scalar_lea.vmem %s2674_s15, 256 }
 0x487   : > { %v1126_v39 = vpop.f32.mrf.mxu0  ;;  %p2157_p3 = scmp.ne.s32.totalorder %s2674_s15, %s2156_s19  ;;  %p2164_p10 = scmp.lt.s32.totalorder %s2162_s26, %s2156_s19 }
 0x489   : > { %v1839_v40 = vpop.f32.mrf.mxu0  ;;  %p2158_p7 = pnand %p2157_p3, %p2426_p9  ;;  %p2165_p1 = por %p2164_p10, %p2163_p5 }
 0x48b   : > { %v1129_v41 = vpop.f32.mrf.mxu0  ;;  %p2159_p11 = pneg %p2158_p7 }
 0x48c   : > { %v1990_v43 = vpack.i.bf16 %v1129_v41, %v1126_v39 }
 0x48d   : > { %v1840_v44 = vpop.f32.mrf.mxu0  ;;  %p2166_p2 = pnand %p2165_p1, %p2159_p11 }
 0x48e   : > { %1991 = vrot.lane.b32.xlu0 %v1990_v43, %s2268_s28 }
 0x48f   : > { %v1257_v45 = vpop.f32.mrf.mxu0 }
 0x491   : > { %v1851_v46 = vpop.f32.mrf.mxu0 }
 0x493   : > { %v1260_v47 = vpop.f32.mrf.mxu0 }
 0x494   : > { %v1995_v48 = vpack.i.bf16 %v1260_v47, %v1257_v45 }
 0x495   : > { %v1852_v49 = vpop.f32.mrf.mxu0 }
 0x496   : > { %1996 = vrot.lane.b32.xlu1 %v1995_v48, %s2269_s30 }
 0x4f8   : > { %v1987_v50 = vpop.permute.xlu1 %1986 }
 0x4f9   : > { %v1989_v0 = vunpack.i.h.bf16 %v1987_v50  ;;  %v1988_v52 = vunpack.i.l.bf16 %v1987_v50 }
 0x4fb   : > { %v1289_v56 = vsel %vm739_vm3, %v866_v28, %v1989_v0  ;;  %v1288_v57 = vsel %vm739_vm3, %v863_v26, %v1988_v52  ;;  %v1724_v26 = vld [vmem:[%s2750_s7] ss:$0 sm:$0xff] }
 0x4fc   : > { %v1725_v28 = vld [vmem:[%s2751_s8] ss:$0 sm:$0xff] }
 0x500   : > { %v1992_v51 = vpop.permute.xlu0 %1991 }
 0x501   : > { %v1994_v53 = vunpack.i.h.bf16 %v1992_v51  ;;  %v1993_v54 = vunpack.i.l.bf16 %v1992_v51 }
 0x503   : > { %v1291_v59 = vsel %vm539_vm1, %v1289_v56, %v1994_v53  ;;  %v1290_v60 = vsel %vm539_vm1, %v1288_v57, %v1993_v54 }
 0x508   : > { %v1997_v55 = vpop.permute.xlu1 %1996 }
 0x509   : > { %v1999_v58 = vunpack.i.h.bf16 %v1997_v55  ;;  %v1998_v35 = vunpack.i.l.bf16 %v1997_v55 }
 0x50b   : > { %v1294_v61 = vsel %vm1292_vm5, %v1291_v59, %v1999_v58  ;;  %v1293_v62 = vsel %vm1292_vm5, %v1290_v60, %v1998_v35 }
 0x50c   : > { %v1295_v63 = vpack.c.bf16 %v1294_v61, %v1293_v62 }
 0x50e   : > { %1862 = vmatmul.mubr.msk.bf16.vlgmr.msra.gmra.mxu1 %vm1328_vm6, %v1295_v63 }
 0x5ce   : > { %v1366_v1 = vpop.f32.mrf.mxu1 }
 0x5cf   : > { %v1367_v2 = vadd.f32 %v1366_v1, %v2520_v8 }
 0x5d0   : > { %v1863_v3 = vpop.f32.mrf.mxu1 }
 0x5d1   : > { %v1373_v4 = vsel %vm539_vm1, %v1367_v2, 0.0 }
 0x5d2   : > { %1374 = vadd.xlane.f32.xlu0 %v1373_v4  ;;  %v1369_v5 = vpop.f32.mrf.mxu1 }
 0x5d3   : > { %v1370_v6 = vadd.f32 %v1369_v5, %v2522_v9 }
 0x5d4   : > { %v1864_v7 = vpop.f32.mrf.mxu1 }
 0x5d5   : > { %v1376_v10 = vsel %vm539_vm1, %v1370_v6, 0.0 }
 0x5d6   : > { %1377 = vadd.xlane.f32.xlu1 %v1376_v10 }
 0x65b   : > { %v1375_v11 = vpop.xlane.xlu0 %1374 }
 0x65c   : > { %v1380_v12 = vmul.f32 0.03125, %v1375_v11 }
 0x65e   : > { %v1382_v13 = vsub.f32 %v1367_v2, %v1380_v12 }
 0x65f   : > { %v1378_v14 = vpop.xlane.xlu1 %1377 }
 0x660   : > { %v1381_v15 = vmul.f32 0.03125, %v1378_v14  ;;  %v1384_v16 = vmul.f32 %v1382_v13, %v1382_v13 }
 0x662   : > { %v1383_v17 = vsub.f32 %v1370_v6, %v1381_v15  ;;  %v1386_v8 = vsel %vm539_vm1, %v1384_v16, 0.0 }
 0x663   : > { %1387 = vadd.xlane.f32.xlu0 %v1386_v8 }
 0x664   : > { %v1385_v18 = vmul.f32 %v1383_v17, %v1383_v17 }
 0x666   : > { %v1389_v19 = vsel %vm539_vm1, %v1385_v18, 0.0 }
 0x667   : > { %1390 = vadd.xlane.f32.xlu0 %v1389_v19 }
 0x6ec   : > { %v1388_v20 = vpop.xlane.xlu0 %1387 }
 0x6ed   : > { %v1392_v9 = vmul.f32 0.03125, %v1388_v20 }
 0x6ef   : > { %v1394_v21 = vadd.f32 1e-06, %v1392_v9 }
 0x6f0   : > { %v1391_v22 = vpop.xlane.xlu0 %1390 }
 0x6f1   : > { %2044 = vrsqrt.f32 %v1394_v21  ;;  %v1393_v23 = vmul.f32 0.03125, %v1391_v22 }
 0x6f3   : > { %v1395_v24 = vadd.f32 1e-06, %v1393_v23 }
 0x6f5   : > { %2046 = vrsqrt.f32 %v1395_v24 }
 0x6fe   : > { %v2045_v25 = vpop.eup %2044 }
 0x6ff   : > { %v1398_v27 = vmul.f32 %v2045_v25, %v1382_v13 }
 0x701   : > { %v1407_v29 = vmul.f32 %v1724_v26, %v1398_v27 }
 0x702   : > { %v2047_v30 = vpop.eup %2046 }
 0x703   : > { %v1416_v31 = vadd.f32 %v1725_v28, %v1407_v29  ;;  %v1399_v32 = vmul.f32 %v2047_v30, %v1383_v17 }
 0x705   : > { %v1408_v33 = vmul.f32 %v1724_v26, %v1399_v32  ;;  %1418 = vst.msk [vmem:[%s492_s5] sm:$0xff] %vm539_vm1, %v1416_v31 }
 0x707   : > { %v1417_v34 = vadd.f32 %v1725_v28, %v1408_v33 }
 0x709   : > { %1419 = vst.msk [vmem:[%s492_s5 + $0x8] sm:$0xff] %vm539_vm1, %v1417_v34 }
 0x70a   : > { %2169 = shalt.err (!%p2166_p2)
}
 0x70b   : > { %s2170_s28 = scalar_lea.hbm %s2672_s23, 256  ;;  %s2174_s20 = scalar_lea.hbm %s2790_s22, 512 }
 0x70c   : > { %p2171_p6 = scmp.ne.s32.totalorder %s2672_s23, %s2170_s28  ;;  %p2175_p0 = scmp.lt.s32.totalorder %s2672_s23, %s2790_s22 }
 0x70d   : > { %p2176_p12 = scmp.lt.s32.totalorder %s2174_s20, %s2170_s28 }
 0x70e   : > { %p2172_p8 = pnand %p2171_p6, %p2426_p9 }
 0x70f   : > { %p2177_p4 = por %p2176_p12, %p2175_p0 }
 0x710   : > { %p2173_p13 = pneg %p2172_p8 }
 0x712   : > { %p2178_p3 = pnand %p2177_p4, %p2173_p13 }
 0x714   : > { %2181 = shalt.err (!%p2178_p3)
}
 0x715   : > { %s2271_s12 = smov 128   ;;  %s2272_s5 = smov 8  }
 0x716   : > { %1877 = dma.vmem_to_hbm [thread:$0]  (%p2426_p9), %s2674_s15, 256, %s2672_s23, %s1421_s21, %s2271_s12, %s2271_s12, %s2272_s5  }
 0x717   : > { %s1426_s10 = scalar_lea.sflag [#allocation14], %s2473_s1 }
 0x718   : > { %s1750_s13 = sshll.u32 %s2244_s16, 7  ;;  %s1469_s19 = sshll.u32 %s2603_s4, 4  ;;  %s1470_s19 = int_to_ptr.vmem [resolvable:$true] %s1469_s19 }
 0x719   : > { %s2791_s26 = sld [smem:[#allocation33_spill]]  ;;  %s2273_s30 = smov 128  }
 0x71a   : > { %1878 = sst [smem:[#allocation16]] (%p2426_p9), %s2273_s30  ;;  %s2274_s1 = smov 256  }
 0x71b   : > { %1879 = sst [smem:[#allocation16 + $0x1]] (%p2426_p9), %s2274_s1  ;;  %s2275_s15 = smov 2  }
 0x71c   : > { %1880 = sst [smem:[#allocation16 + $0x2]] (%p2426_p9), %s2275_s15  ;;  %s2276_s23 = smov 64  }
 0x71d   : > { %1881 = sst [smem:[#allocation16 + $0x3]] (%p2426_p9), %s2276_s23  ;;  %s2277_s16 = smov 4  }
 0x71e   : > { %1882 = sst [smem:[#allocation16 + $0x4]] (%p2426_p9), %s2276_s23  ;;  %s2278_s4 = smov 131072  }
 0x71f   : > { %s1458_s28 = scalar_lea.hbm %s2791_s26, %s1750_s13  ;;  %1883 = sst [smem:[#allocation16 + $0x5]] (%p2426_p9), %s2277_s16 }
 0x720   : > { %s2279_s21 = smov 0  }
 0x721   : > { %1884 = dma.general (%p2426_p9), %s1470_s19, 512, %s1458_s28, %s1426_s10, %s2278_s4, [#allocation16], %s2279_s21, 0  }
 0x722 PF: > { %s2792_s11 = sld [smem:[#allocation23_spill]]  ;;  %p2795_p11 = scmp.ge.s32.totalorder %s2252_s18, 2 }
 0x723   : > { %s2793_s20 = sld [smem:[#allocation25_spill]] }
 0x728   : > { %s1497_s24 = sand.u32 1, %s2792_s11  }
 0x729   : > { %p2794_p7 = scmp.ne.s32.totalorder %s2793_s20, 0  ;;  %s1498_s27 = scalar_lea.sflag [#allocation6], %s1497_s24 }
 0x72b   : > { %p1902_p5 = pnand %p2795_p11, %p2794_p7 }
 0x72d   : > { %p1903_p10 = pneg %p1902_p5 }
 0x72f   : > { %2223 = dma.done.wait (%p1903_p10), %s1498_s27, 256  }
 0x730   : > { %2225 = vsyncadd (%p1903_p10), %s1498_s27, 4294967040  ;;  %s1507_s12 = scalar_lea.sflag [#allocation14], %s1497_s24 }
 0x731   : > { %2227 = dma.done.wait (%p1903_p10), %s1507_s12, 512  }
 0x732   : > { %2229 = vsyncadd (%p1903_p10), %s1507_s12, 4294966784  ;;  %s34_s18 = sadd.s32 1, %s2252_s18   ;;  %s2796_s29 = sld [smem:[#allocation24_spill]] }
 0x733   : > { %p31_p1 = scmp.ge.s32.totalorder %s34_s18, 4   ;;  %s2797_s15 = sld [smem:[#allocation28_spill]] }
 0x734   : > { %s2798_s5 = sld [smem:[#allocation26_spill]]  ;;  %s2799_s13 = smov %s2236_s14 }
 0x735   : > { %s2801_s16 = smov %s2248_s17 }
 0x736   :  { %33 = sbr.rel (!%p31_p1) target bundleno = 17 (0x11), region = 154 }
 0x738   : > { %s2800_s14 = smov %s2796_s29 }
 0x73a   : > { %s2802_s17 = smov %s2798_s5 }
 0x73b   :  { %1512 = vsyncpa [#allocation5], 1 }
 0x73c   :  { %1514 = vsyncpa [#allocation5 + $0x1], 1 }
 0x73d   :  { %1515 = vsyncpa [#allocation8], 1 }
 0x73e   :  { %1517 = vsyncpa [#allocation8 + $0x1], 1 }
 0x73f   :  { %1518 = vsyncpa [#allocation11], 1 }
 0x740   :  { %1519 = vsyncpa [#allocation6], 1 }
 0x741   :  { %1521 = vsyncpa [#allocation6 + $0x1], 1 }
 0x742   :  { %1522 = vsyncpa [#allocation14], 1 }
 0x743   :  { %1524 = vsyncpa [#allocation14 + $0x1], 1 }

</bundles_post_ra>
